<compile_context>
chip_gen: v6e
topology: v6e:2x2x1
jax: 0.10.0
libtpu: 0.0.40
codegen_flags: <defaults>
</compile_context>

<pallas_src>
import functools

import jax
import jax.numpy as jnp
from jax import lax
from jax.experimental import pallas as pl
from jax.experimental.pallas import tpu as pltpu


_TAPS = tuple((dy, dx) for dy in (-1, 0, 1) for dx in (-1, 0, 1))   # 3x3 tap offsets
_VMEM_LIMIT = 32 * 1024 * 1024


def _compiler_params(sem):
    return pltpu.CompilerParams(dimension_semantics=sem,
                                vmem_limit_bytes=_VMEM_LIMIT)


# ---------------------------------------------------------------------------
# Tiling helpers
# ---------------------------------------------------------------------------
def _lane_tile(total, unit, rows, itemsize=4, budget=2 << 20):
    """Lane tile: a multiple of `unit` (= H*W, whole samples per tile) dividing
    `total` (= N*H*W), keeping rows*tile*itemsize under `budget`, and when possible
    leaving >= 2 grid steps so v7x's two TensorCores both get work."""
    cands = [t for t in range(unit, total + 1, unit) if total % t == 0]
    fit = [t for t in cands if rows * t * itemsize <= budget] or cands[:1]
    t = max(fit)
    if t == total:
        smaller = [c for c in fit if c < total and c >= 128]
        if smaller:
            t = max(smaller)
    return t


def _row_tile(rows, max_rows=256):
    """Largest divisor of `rows` that is a multiple of 8 and <= max_rows, else all rows."""
    cands = [t for t in range(8, min(rows, max_rows) + 1, 8) if rows % t == 0]
    return max(cands) if cands else rows


# ---------------------------------------------------------------------------
# Shared in-kernel helpers
# ---------------------------------------------------------------------------
def _shift_lanes(v, d):
    """out[..., q] == v[..., (q + d) % T]  (jnp.roll semantics via static lane slices).

    Wrapped entries correspond to out-of-image taps and are zeroed by the tap mask."""
    t = v.shape[-1]
    k = d % t
    if k == 0:
        return v
    return jnp.concatenate([v[..., k:], v[..., :k]], axis=-1)


def _tile_lanes(v, k):
    """Repeat the (rows, H*W) block k times along lanes -> (rows, k*H*W)."""
    if k == 1:
        return v
    return jnp.concatenate([v] * k, axis=-1)


def _conv_taps(xv, w_ref, mask_ref, img_w):
    """3x3 'same' conv as 9 shifted+masked MXU matmuls on a lane-flattened tile.

    xv       : (Cin, T) tile value, T a multiple of H*W (whole samples resident).
    w_ref    : (9, R, Cin) weight ref, equalized-LR gain pre-folded.
    mask_ref : (9, 1, T) tap-validity masks (0 where the tap source is outside the image).
    Returns a float32 (R, T) accumulator.
    """
    mm_dtype = w_ref.dtype
    acc = None
    for t, (dy, dx) in enumerate(_TAPS):
        d = dy * img_w + dx
        sh = _shift_lanes(xv, d)
        if d != 0:
            sh = sh * mask_ref[t].astype(sh.dtype)      # emulate zero padding
        part = jnp.dot(w_ref[t], sh.astype(mm_dtype),
                       preferred_element_type=jnp.float32)
        acc = part if acc is None else acc + part
    return acc


def _tap_masks(h, w, n, dtype):
    """(9, 1, N*H*W) masks; lane index = sample*H*W + y*W + x."""
    yy = lax.broadcasted_iota(jnp.int32, (h, w), 0)
    xx = lax.broadcasted_iota(jnp.int32, (h, w), 1)
    rows = []
    for dy, dx in _TAPS:
        ok = (yy + dy >= 0) & (yy + dy < h) & (xx + dx >= 0) & (xx + dx < w)
        rows.append(ok.reshape(1, h * w))
    m = jnp.stack(rows, axis=0).astype(dtype)           # (9, 1, H*W)
    return jnp.tile(m, (1, 1, n))                       # (9, 1, N*H*W)


def _prep_weight(weight, dtype):
    """(R, Cin, 3, 3) -> (9, R, Cin) with the equalized-LR gain folded in."""
    cin = weight.shape[1]
    scale = (2.0 / (cin * 9)) ** 0.5
    w3 = (weight.astype(jnp.float32) * scale).transpose(2, 3, 0, 1)
    return w3.reshape(9, weight.shape[0], cin).astype(dtype)


def _inv_std(total_sum, total_sumsq, count):
    """1 / torch.std(x) (unbiased) from one-pass partials; returns (1,) float32."""
    var = (total_sumsq - total_sum * total_sum / count) / (count - 1)
    return lax.rsqrt(var).reshape(1).astype(jnp.float32)


# ---------------------------------------------------------------------------
# Kernel 1: fused latent convs (to_ysi/to_ybi of both AdaINs in one call)
# ---------------------------------------------------------------------------
def _latent_conv_kernel(x_ref, w_ref, b_ref, mask_ref, o_ref, *, img_w):
    acc = _conv_taps(x_ref[...], w_ref, mask_ref, img_w)
    y = acc + b_ref[...].astype(jnp.float32)
    o_ref[...] = y.astype(o_ref.dtype)


def latent_convs(lat_cl, weight, bias, masks, *, hw, img_w):
    """lat_cl: (Clat, L); weight: (R, Clat, 3, 3); bias: (R,) -> (R, L)."""
    cin, L = lat_cl.shape
    r = weight.shape[0]
    w3 = _prep_weight(weight, lat_cl.dtype)
    b2 = bias.reshape(r, 1).astype(jnp.float32)
    rt = _row_tile(r)
    t = _lane_tile(L, hw, rows=max(cin, rt), itemsize=lat_cl.dtype.itemsize)
    grid = (r // rt, L // t)
    return pl.pallas_call(
        functools.partial(_latent_conv_kernel, img_w=img_w),
        out_shape=jax.ShapeDtypeStruct((r, L), lat_cl.dtype),
        grid=grid,
        in_specs=[
            pl.BlockSpec((cin, t), lambda i, j: (0, j)),          # latent tile
            pl.BlockSpec((9, rt, cin), lambda i, j: (0, i, 0)),   # weights (per row tile)
            pl.BlockSpec((rt, 1), lambda i, j: (i, 0)),           # bias
            pl.BlockSpec((9, 1, t), lambda i, j: (0, 0, j)),      # tap masks
        ],
        out_specs=pl.BlockSpec((rt, t), lambda i, j: (i, j)),
        compiler_params=_compiler_params(("parallel", "parallel")),
    )(lat_cl, w3, b2, masks)


# ---------------------------------------------------------------------------
# Kernel 2: PixelNorm + noise, emitting AdaIN_0 statistic partials
# ---------------------------------------------------------------------------
def _pixnorm_kernel(x_ref, noise_ref, h_ref, mean_ref, ssq_ref, *, eps):
    x = x_ref[...].astype(jnp.float32)                                  # (C, T)
    inv = lax.rsqrt(jnp.mean(x * x, axis=0, keepdims=True) + eps)
    h = x * inv + noise_ref[...].astype(jnp.float32)
    h_ref[...] = h.astype(h_ref.dtype)
    mean_ref[...] = jnp.mean(h, axis=0, keepdims=True)                  # per-location channel mean
    ssq_ref[...] = jnp.sum(h * h, axis=0, keepdims=True)                # partial for global std


def pixnorm_noise_stats(x_cl, noise_cl, *, hw, eps=1e-8):
    c, L = x_cl.shape
    t = _lane_tile(L, hw, rows=c, itemsize=x_cl.dtype.itemsize)
    return pl.pallas_call(
        functools.partial(_pixnorm_kernel, eps=eps),
        out_shape=(jax.ShapeDtypeStruct((c, L), x_cl.dtype),
                   jax.ShapeDtypeStruct((1, L), jnp.float32),
                   jax.ShapeDtypeStruct((1, L), jnp.float32)),
        grid=(L // t,),
        in_specs=[pl.BlockSpec((c, t), lambda j: (0, j)),
                  pl.BlockSpec((c, t), lambda j: (0, j))],
        out_specs=(pl.BlockSpec((c, t), lambda j: (0, j)),
                   pl.BlockSpec((1, t), lambda j: (0, j)),
                   pl.BlockSpec((1, t), lambda j: (0, j))),
        compiler_params=_compiler_params(("parallel",)),
    )(x_cl, noise_cl)


# ---------------------------------------------------------------------------
# Kernel 3: AdaIN_0 modulation + equalized 3x3 conv + LeakyReLU + AdaIN_1 stats
# ---------------------------------------------------------------------------
def _mod_conv_kernel(inv_ref, x_ref, ysi_ref, ybi_ref, mean_ref, w_ref, b_ref, mask_ref,
                     o_ref, csum_ref, ssq_ref, *, img_w, hw, slope):
    inv = inv_ref[0]                                                    # f32 SMEM scalar
    x = x_ref[...].astype(jnp.float32)                                  # (Cin, T)
    k = x.shape[1] // hw
    m = _tile_lanes(mean_ref[...].astype(jnp.float32), k)               # (rows_mean, T)
    xm = (ysi_ref[...].astype(jnp.float32) * (x - m) * inv
          + ybi_ref[...].astype(jnp.float32))                           # AdaIN_0 modulation
    acc = _conv_taps(xm, w_ref, mask_ref, img_w)                        # (RT, T)
    y = acc + b_ref[...].astype(jnp.float32)
    y = jnp.where(y >= 0, y, slope * y)                                 # LeakyReLU
    o_ref[...] = y.astype(o_ref.dtype)
    csum_ref[0] = jnp.sum(y, axis=0, keepdims=True)                     # AdaIN_1 mean partial
    ssq_ref[0] = jnp.sum(y * y, axis=0, keepdims=True)                  # AdaIN_1 std partial


def adain_conv_lrelu_stats(inv_std0, h0, ysi0, ybi0, mean0q, weight, bias, masks,
                           *, hw, img_w, slope):
    cin, L = h0.shape
    cout = weight.shape[0]
    mr = mean0q.shape[0]
    w3 = _prep_weight(weight, h0.dtype)
    b2 = bias.reshape(cout, 1).astype(jnp.float32)
    rt = _row_tile(cout)
    n_rt = cout // rt
    t = _lane_tile(L, hw, rows=max(cin, rt), itemsize=h0.dtype.itemsize)
    grid = (n_rt, L // t)
    return pl.pallas_call(
        functools.partial(_mod_conv_kernel, img_w=img_w, hw=hw, slope=slope),
        out_shape=(jax.ShapeDtypeStruct((cout, L), h0.dtype),
                   jax.ShapeDtypeStruct((n_rt, 1, L), jnp.float32),
                   jax.ShapeDtypeStruct((n_rt, 1, L), jnp.float32)),
        grid=grid,
        in_specs=[
            pl.BlockSpec(memory_space=pltpu.SMEM),                      # inv_std0, (1,) f32
            pl.BlockSpec((cin, t), lambda i, j: (0, j)),                # h0
            pl.BlockSpec((cin, t), lambda i, j: (0, j)),                # ysi0
            pl.BlockSpec((cin, t), lambda i, j: (0, j)),                # ybi0
            pl.BlockSpec((mr, hw), lambda i, j: (0, 0)),                # channel-mean rows
            pl.BlockSpec((9, rt, cin), lambda i, j: (0, i, 0)),         # weights
            pl.BlockSpec((rt, 1), lambda i, j: (i, 0)),                 # bias
            pl.BlockSpec((9, 1, t), lambda i, j: (0, 0, j)),            # tap masks
        ],
        out_specs=(pl.BlockSpec((rt, t), lambda i, j: (i, j)),
                   pl.BlockSpec((1, 1, t), lambda i, j: (i, 0, j)),
                   pl.BlockSpec((1, 1, t), lambda i, j: (i, 0, j))),
        compiler_params=_compiler_params(("parallel", "parallel")),
    )(inv_std0, h0, ysi0, ybi0, mean0q, w3, b2, masks)


# ---------------------------------------------------------------------------
# Kernel 4: final AdaIN_1 modulation
# ---------------------------------------------------------------------------
def _adain_kernel(inv_ref, x_ref, ysi_ref, ybi_ref, mean_ref, o_ref, *, hw):
    inv = inv_ref[0]
    x = x_ref[...].astype(jnp.float32)
    k = x.shape[1] // hw
    m = _tile_lanes(mean_ref[...].astype(jnp.float32), k)
    out = (ysi_ref[...].astype(jnp.float32) * (x - m) * inv
           + ybi_ref[...].astype(jnp.float32))
    o_ref[...] = out.astype(o_ref.dtype)


def adain_modulate(inv_std, x_cl, ysi, ybi, mean_q, *, hw):
    c, L = x_cl.shape
    mr = mean_q.shape[0]
    t = _lane_tile(L, hw, rows=c, itemsize=x_cl.dtype.itemsize)
    return pl.pallas_call(
        functools.partial(_adain_kernel, hw=hw),
        out_shape=jax.ShapeDtypeStruct((c, L), x_cl.dtype),
        grid=(L // t,),
        in_specs=[
            pl.BlockSpec(memory_space=pltpu.SMEM),                      # inv_std, (1,) f32
            pl.BlockSpec((c, t), lambda j: (0, j)),
            pl.BlockSpec((c, t), lambda j: (0, j)),
            pl.BlockSpec((c, t), lambda j: (0, j)),
            pl.BlockSpec((mr, hw), lambda j: (0, 0)),
        ],
        out_specs=pl.BlockSpec((c, t), lambda j: (0, j)),
        compiler_params=_compiler_params(("parallel",)),
    )(inv_std, x_cl, ysi, ybi, mean_q)


# ---------------------------------------------------------------------------
# Module wrapper mirroring FirstBlockG (deterministic init).
# ---------------------------------------------------------------------------
class FirstBlockGPallas:
    """JAX/Pallas port of FirstBlockG. `latent_channels` exposes the AdaIN conv
    in_channels (512 in the PyTorch default) so the test can use a small latent."""

    def __init__(self, in_channels, out_channels, negative_slope=0.01,
                 latent_channels=512, *, key, param_dtype=jnp.float32):
        assert in_channels == out_channels, (
            "FirstBlockG's AdaIN_0 multiplies a Cout-channel style into a Cin-channel "
            "activation; the PyTorch module only works when in_channels == out_channels")
        self.negative_slope = float(negative_slope)
        self.in_channels, self.out_channels = in_channels, out_channels
        ks = jax.random.split(key, 5)

        def wconv(k, cout, cin):
            return jax.random.normal(k, (cout, cin, 3, 3), param_dtype)

        self.w_main = wconv(ks[0], out_channels, in_channels)
        self.b_main = jnp.zeros((out_channels,), param_dtype)
        self.w_ysi = [wconv(ks[1], out_channels, latent_channels),
                      wconv(ks[3], out_channels, latent_channels)]
        self.w_ybi = [wconv(ks[2], out_channels, latent_channels),
                      wconv(ks[4], out_channels, latent_channels)]
        self.b_ysi = [jnp.zeros((out_channels,), param_dtype) for _ in range(2)]
        self.b_ybi = [jnp.zeros((out_channels,), param_dtype) for _ in range(2)]
        # Fused latent-conv weights: rows = [ysi0 | ybi0 | ysi1 | ybi1]
        self.w_lat = jnp.concatenate(
            [self.w_ysi[0], self.w_ybi[0], self.w_ysi[1], self.w_ybi[1]], axis=0)
        self.b_lat = jnp.concatenate(
            [self.b_ysi[0], self.b_ybi[0], self.b_ysi[1], self.b_ybi[1]], axis=0)

    def __call__(self, x, latent, noise):
        n, c, h, w = x.shape
        hw, L = h * w, n * h * w
        cout = self.out_channels
        # PyTorch's (N,C,H,W) - (N,H,W) trailing broadcast only type-checks when
        # batch == channels (or batch == 1); we reproduce that quirk faithfully.
        assert n in (1, c) and n in (1, cout), (
            "AdaIN mean broadcast (PyTorch quirk) requires batch == channels or batch == 1")

        def to_cl(a):
            return a.transpose(1, 0, 2, 3).reshape(a.shape[1], L)

        x_cl, noise_cl, lat_cl = to_cl(x), to_cl(noise), to_cl(latent)
        masks = _tap_masks(h, w, n, x.dtype)

        # 1. all four latent convs in one fused pallas_call
        y_all = latent_convs(lat_cl, self.w_lat, self.b_lat, masks, hw=hw, img_w=w)
        ysi0, ybi0, ysi1, ybi1 = (y_all[i * cout:(i + 1) * cout] for i in range(4))

        # 2. pixel-norm + noise, emitting AdaIN_0 statistic partials
        h0, mean0, ssq0 = pixnorm_noise_stats(x_cl, noise_cl, hw=hw)
        inv_std0 = _inv_std(jnp.sum(mean0) * c, jnp.sum(ssq0), c * L)
        mean0q = mean0.reshape(n, hw)          # used indexed by channel (quirk)

        # 3. fused AdaIN_0 modulation + equalized conv + LeakyReLU + AdaIN_1 stats
        h1, csum1, ssq1 = adain_conv_lrelu_stats(
            inv_std0, h0, ysi0, ybi0, mean0q, self.w_main, self.b_main, masks,
            hw=hw, img_w=w, slope=self.negative_slope)
        mean1q = (jnp.sum(csum1, axis=(0, 1)) / cout).reshape(n, hw)
        inv_std1 = _inv_std(jnp.sum(csum1), jnp.sum(ssq1), cout * L)

        # 4. final AdaIN_1 modulation
        out_cl = adain_modulate(inv_std1, h1, ysi1, ybi1, mean1q, hw=hw)
        return out_cl.reshape(cout, n, h, w).transpose(1, 0, 2, 3)


# ---------------------------------------------------------------------------
# Pure-JAX reference (independent of the Pallas path) for correctness checking.
# ---------------------------------------------------------------------------
def _ref_conv3x3(x, w, b, slope=None):
    cin = x.shape[1]
    scale = (2.0 / (cin * 9)) ** 0.5
    y = lax.conv_general_dilated(
        x, w, window_strides=(1, 1), padding=((1, 1), (1, 1)),
        dimension_numbers=("NCHW", "OIHW", "NCHW"),
        precision=lax.Precision.HIGHEST) * scale
    y = y + b[None, :, None, None]
    if slope is not None:
        y = jnp.where(y >= 0, y, slope * y)
    return y


def _ref_adain(x, latent, wys, bys, wyb, byb):
    ysi = _ref_conv3x3(latent, wys, bys)
    ybi = _ref_conv3x3(latent, wyb, byb)
    mean = jnp.mean(x, axis=1)                # (N, H, W)
    std = jnp.std(x, ddof=1)                  # scalar, unbiased (torch.std default)
    normalized = (x - mean) / std             # same trailing-dim broadcast as PyTorch
    return ysi * normalized + ybi


def _ref_forward(block, x, latent, noise, eps=1e-8):
    h = x / jnp.sqrt(jnp.mean(x * x, axis=1, keepdims=True) + eps) + noise
    h = _ref_adain(h, latent, block.w_ysi[0], block.b_ysi[0],
                   block.w_ybi[0], block.b_ybi[0])
    h = _ref_conv3x3(h, block.w_main, block.b_main, block.negative_slope)
    return _ref_adain(h, latent, block.w_ysi[1], block.b_ysi[1],
                      block.w_ybi[1], block.b_ybi[1])


if __name__ == "__main__":
    key = jax.random.PRNGKey(0)
    k_param, k_x, k_lat, k_noise = jax.random.split(key, 4)

    # The original AdaIN broadcast only type-checks when batch == channels (or 1),
    # and ysi * normalized needs in_channels == out_channels -> pick N == Cin == Cout.
    N, C, H, W = 4, 4, 8, 8
    C_LAT = 8

    x = jax.random.normal(k_x, (N, C, H, W), jnp.float32)
    latent = jax.random.normal(k_lat, (N, C_LAT, H, W), jnp.float32)
    noise = 0.1 * jax.random.normal(k_noise, (N, C, H, W), jnp.float32)

    block = FirstBlockGPallas(in_channels=C, out_channels=C, negative_slope=0.01,
                              latent_channels=C_LAT, key=k_param)

    fwd = jax.jit(block.__call__)
    out = jax.block_until_ready(fwd(x, latent, noise))
    assert out.shape == (N, C, H, W)
    assert out.dtype == x.dtype

    ref = jax.block_until_ready(_ref_forward(block, x, latent, noise))
    max_diff = float(jnp.max(jnp.abs(out - ref)))
    assert jnp.allclose(out, ref, rtol=1e-3, atol=1e-3), f"max |diff| = {max_diff}"

    print("KERNEL_OK")
</pallas_src>

<mosaic_0001>
module attributes {stable_mosaic.version = 11 : i64} {
  func.func @_pixnorm_kernel(%arg0: i32, %arg1: memref<4x128xf32, #tpu.memory_space<vmem>>, %arg2: memref<4x128xf32, #tpu.memory_space<vmem>>, %arg3: memref<4x128xf32, #tpu.memory_space<vmem>>, %arg4: memref<1x128xf32, #tpu.memory_space<vmem>>, %arg5: memref<1x128xf32, #tpu.memory_space<vmem>>) attributes {dimension_semantics = [#tpu.dimension_semantics<parallel>], iteration_bounds = array<i64: 2>, scalar_prefetch = 0 : i64, scratch_operands = 0 : i64, tpu.core_type = #tpu.core_type<tc>, window_params = [{transform_indices = @transform_0, window_bounds = array<i64: 4, 128>}, {transform_indices = @transform_1, window_bounds = array<i64: 4, 128>}, {transform_indices = @transform_2, window_bounds = array<i64: 4, 128>}, {transform_indices = @transform_3, window_bounds = array<i64: 1, 128>}, {transform_indices = @transform_4, window_bounds = array<i64: 1, 128>}]} {
    %c0 = arith.constant 0 : index
    %c0_0 = arith.constant 0 : index
    %0 = vector.load %arg1[%c0, %c0_0] : memref<4x128xf32, #tpu.memory_space<vmem>>, vector<4x128xf32>
    %1 = arith.mulf %0, %0 : vector<4x128xf32>
    %cst = arith.constant dense<0.000000e+00> : vector<128xf32>
    %2 = vector.multi_reduction <add>, %1, %cst [0] : vector<4x128xf32> to vector<128xf32>
    %3 = vector.shape_cast %2 : vector<128xf32> to vector<1x128xf32>
    %cst_1 = arith.constant 4.000000e+00 : f32
    %4 = vector.broadcast %cst_1 : f32 to vector<1x128xf32>
    %5 = arith.divf %3, %4 : vector<1x128xf32>
    %cst_2 = arith.constant 9.99999993E-9 : f32
    %6 = vector.broadcast %cst_2 : f32 to vector<1x128xf32>
    %7 = arith.addf %5, %6 : vector<1x128xf32>
    %8 = math.rsqrt %7 : vector<1x128xf32>
    %9 = vector.broadcast %8 : vector<1x128xf32> to vector<4x128xf32>
    %10 = arith.mulf %0, %9 : vector<4x128xf32>
    %c0_3 = arith.constant 0 : index
    %c0_4 = arith.constant 0 : index
    %11 = vector.load %arg2[%c0_3, %c0_4] : memref<4x128xf32, #tpu.memory_space<vmem>>, vector<4x128xf32>
    %12 = arith.addf %10, %11 : vector<4x128xf32>
    %c0_5 = arith.constant 0 : index
    %c0_6 = arith.constant 0 : index
    %13 = vector.load %arg3[%c0_5, %c0_6] : memref<4x128xf32, #tpu.memory_space<vmem>>, vector<4x128xf32>
    tpu.vector_store %arg3[%c0_5, %c0_6], %12 {strides = array<i32>} : memref<4x128xf32, #tpu.memory_space<vmem>>, vector<4x128xf32>,
    %cst_7 = arith.constant dense<0.000000e+00> : vector<128xf32>
    %14 = vector.multi_reduction <add>, %12, %cst_7 [0] : vector<4x128xf32> to vector<128xf32>
    %15 = vector.shape_cast %14 : vector<128xf32> to vector<1x128xf32>
    %cst_8 = arith.constant 4.000000e+00 : f32
    %16 = vector.broadcast %cst_8 : f32 to vector<1x128xf32>
    %17 = arith.divf %15, %16 : vector<1x128xf32>
    %c0_9 = arith.constant 0 : index
    %c0_10 = arith.constant 0 : index
    %18 = vector.load %arg4[%c0_9, %c0_10] : memref<1x128xf32, #tpu.memory_space<vmem>>, vector<1x128xf32>
    tpu.vector_store %arg4[%c0_9, %c0_10], %17 {strides = array<i32>} : memref<1x128xf32, #tpu.memory_space<vmem>>, vector<1x128xf32>,
    %19 = arith.mulf %12, %12 : vector<4x128xf32>
    %cst_11 = arith.constant dense<0.000000e+00> : vector<128xf32>
    %20 = vector.multi_reduction <add>, %19, %cst_11 [0] : vector<4x128xf32> to vector<128xf32>
    %21 = vector.shape_cast %20 : vector<128xf32> to vector<1x128xf32>
    %c0_12 = arith.constant 0 : index
    %c0_13 = arith.constant 0 : index
    %22 = vector.load %arg5[%c0_12, %c0_13] : memref<1x128xf32, #tpu.memory_space<vmem>>, vector<1x128xf32>
    tpu.vector_store %arg5[%c0_12, %c0_13], %21 {strides = array<i32>} : memref<1x128xf32, #tpu.memory_space<vmem>>, vector<1x128xf32>,
    return
  }
  func.func @transform_0(%arg0: i32) -> (i32, i32) {
    %c0_i32 = arith.constant 0 : i32
    %c0_i32_0 = arith.constant 0 : i32
    return %c0_i32, %arg0 : i32, i32
  }
  func.func @transform_1(%arg0: i32) -> (i32, i32) {
    %c0_i32 = arith.constant 0 : i32
    %c0_i32_0 = arith.constant 0 : i32
    return %c0_i32, %arg0 : i32, i32
  }
  func.func @transform_2(%arg0: i32) -> (i32, i32) {
    %c0_i32 = arith.constant 0 : i32
    %c0_i32_0 = arith.constant 0 : i32
    return %c0_i32, %arg0 : i32, i32
  }
  func.func @transform_3(%arg0: i32) -> (i32, i32) {
    %c0_i32 = arith.constant 0 : i32
    %c0_i32_0 = arith.constant 0 : i32
    return %c0_i32, %arg0 : i32, i32
  }
  func.func @transform_4(%arg0: i32) -> (i32, i32) {
    %c0_i32 = arith.constant 0 : i32
    %c0_i32_0 = arith.constant 0 : i32
    return %c0_i32, %arg0 : i32, i32
  }
}

module attributes {stable_mosaic.version = 11 : i64} {
  func.func @_latent_conv_kernel(%arg0: i32, %arg1: i32, %arg2: memref<8x128xf32, #tpu.memory_space<vmem>>, %arg3: memref<9x16x8xf32, #tpu.memory_space<vmem>>, %arg4: memref<16x1xf32, #tpu.memory_space<vmem>>, %arg5: memref<9x1x128xf32, #tpu.memory_space<vmem>>, %arg6: memref<16x128xf32, #tpu.memory_space<vmem>>) attributes {dimension_semantics = [#tpu.dimension_semantics<parallel>, #tpu.dimension_semantics<parallel>], iteration_bounds = array<i64: 1, 2>, scalar_prefetch = 0 : i64, scratch_operands = 0 : i64, tpu.core_type = #tpu.core_type<tc>, window_params = [{transform_indices = @transform_0, window_bounds = array<i64: 8, 128>}, {transform_indices = @transform_1, window_bounds = array<i64: 9, 16, 8>}, {transform_indices = @transform_2, window_bounds = array<i64: 16, 1>}, {transform_indices = @transform_3, window_bounds = array<i64: 9, 1, 128>}, {transform_indices = @transform_4, window_bounds = array<i64: 16, 128>}]} {
    %c0 = arith.constant 0 : index
    %c0_0 = arith.constant 0 : index
    %0 = vector.load %arg2[%c0, %c0_0] : memref<8x128xf32, #tpu.memory_space<vmem>>, vector<8x128xf32>
    %1 = vector.extract_strided_slice %0 {offsets = [0, 119], sizes = [8, 9], strides = [1, 1]} : vector<8x128xf32> to vector<8x9xf32>
    %2 = vector.extract_strided_slice %0 {offsets = [0, 0], sizes = [8, 119], strides = [1, 1]} : vector<8x128xf32> to vector<8x119xf32>
    %3 = tpu.concatenate %1, %2 in 1 : vector<8x9xf32>, vector<8x119xf32> -> vector<8x128xf32>
    %c0_1 = arith.constant 0 : index
    %c0_2 = arith.constant 0 : index
    %c0_3 = arith.constant 0 : index
    %4 = vector.load %arg5[%c0_1, %c0_2, %c0_3] : memref<9x1x128xf32, #tpu.memory_space<vmem>>, vector<1x1x128xf32>
    %5 = vector.shape_cast %4 : vector<1x1x128xf32> to vector<1x128xf32>
    %6 = vector.broadcast %5 : vector<1x128xf32> to vector<8x128xf32>
    %7 = arith.mulf %3, %6 : vector<8x128xf32>
    %c0_4 = arith.constant 0 : index
    %c0_5 = arith.constant 0 : index
    %c0_6 = arith.constant 0 : index
    %8 = vector.load %arg3[%c0_4, %c0_5, %c0_6] : memref<9x16x8xf32, #tpu.memory_space<vmem>>, vector<1x16x8xf32>
    %9 = vector.shape_cast %8 : vector<1x16x8xf32> to vector<16x8xf32>
    %cst = arith.constant dense<0.000000e+00> : vector<16x128xf32>
    %10 = tpu.matmul %9, %7, %cst {dimension_numbers = #tpu.dot_dimension_numbers<[1], [0], [0], [1], [0, 0, 1, 1], [], []>} : vector<16x8xf32>, vector<8x128xf32>, vector<16x128xf32> -> vector<16x128xf32>
    %11 = vector.extract_strided_slice %0 {offsets = [0, 120], sizes = [8, 8], strides = [1, 1]} : vector<8x128xf32> to vector<8x8xf32>
    %12 = vector.extract_strided_slice %0 {offsets = [0, 0], sizes = [8, 120], strides = [1, 1]} : vector<8x128xf32> to vector<8x120xf32>
    %13 = tpu.concatenate %11, %12 in 1 : vector<8x8xf32>, vector<8x120xf32> -> vector<8x128xf32>
    %c1 = arith.constant 1 : index
    %c0_7 = arith.constant 0 : index
    %c0_8 = arith.constant 0 : index
    %14 = vector.load %arg5[%c1, %c0_7, %c0_8] : memref<9x1x128xf32, #tpu.memory_space<vmem>>, vector<1x1x128xf32>
    %15 = vector.shape_cast %14 : vector<1x1x128xf32> to vector<1x128xf32>
    %16 = vector.broadcast %15 : vector<1x128xf32> to vector<8x128xf32>
    %17 = arith.mulf %13, %16 : vector<8x128xf32>
    %c1_9 = arith.constant 1 : index
    %c0_10 = arith.constant 0 : index
    %c0_11 = arith.constant 0 : index
    %18 = vector.load %arg3[%c1_9, %c0_10, %c0_11] : memref<9x16x8xf32, #tpu.memory_space<vmem>>, vector<1x16x8xf32>
    %19 = vector.shape_cast %18 : vector<1x16x8xf32> to vector<16x8xf32>
    %cst_12 = arith.constant dense<0.000000e+00> : vector<16x128xf32>
    %20 = tpu.matmul %19, %17, %cst_12 {dimension_numbers = #tpu.dot_dimension_numbers<[1], [0], [0], [1], [0, 0, 1, 1], [], []>} : vector<16x8xf32>, vector<8x128xf32>, vector<16x128xf32> -> vector<16x128xf32>
    %21 = arith.addf %10, %20 : vector<16x128xf32>
    %22 = vector.extract_strided_slice %0 {offsets = [0, 121], sizes = [8, 7], strides = [1, 1]} : vector<8x128xf32> to vector<8x7xf32>
    %23 = vector.extract_strided_slice %0 {offsets = [0, 0], sizes = [8, 121], strides = [1, 1]} : vector<8x128xf32> to vector<8x121xf32>
    %24 = tpu.concatenate %22, %23 in 1 : vector<8x7xf32>, vector<8x121xf32> -> vector<8x128xf32>
    %c2 = arith.constant 2 : index
    %c0_13 = arith.constant 0 : index
    %c0_14 = arith.constant 0 : index
    %25 = vector.load %arg5[%c2, %c0_13, %c0_14] : memref<9x1x128xf32, #tpu.memory_space<vmem>>, vector<1x1x128xf32>
    %26 = vector.shape_cast %25 : vector<1x1x128xf32> to vector<1x128xf32>
    %27 = vector.broadcast %26 : vector<1x128xf32> to vector<8x128xf32>
    %28 = arith.mulf %24, %27 : vector<8x128xf32>
    %c2_15 = arith.constant 2 : index
    %c0_16 = arith.constant 0 : index
    %c0_17 = arith.constant 0 : index
    %29 = vector.load %arg3[%c2_15, %c0_16, %c0_17] : memref<9x16x8xf32, #tpu.memory_space<vmem>>, vector<1x16x8xf32>
    %30 = vector.shape_cast %29 : vector<1x16x8xf32> to vector<16x8xf32>
    %cst_18 = arith.constant dense<0.000000e+00> : vector<16x128xf32>
    %31 = tpu.matmul %30, %28, %cst_18 {dimension_numbers = #tpu.dot_dimension_numbers<[1], [0], [0], [1], [0, 0, 1, 1], [], []>} : vector<16x8xf32>, vector<8x128xf32>, vector<16x128xf32> -> vector<16x128xf32>
    %32 = arith.addf %21, %31 : vector<16x128xf32>
    %33 = vector.extract_strided_slice %0 {offsets = [0, 127], sizes = [8, 1], strides = [1, 1]} : vector<8x128xf32> to vector<8x1xf32>
    %34 = vector.extract_strided_slice %0 {offsets = [0, 0], sizes = [8, 127], strides = [1, 1]} : vector<8x128xf32> to vector<8x127xf32>
    %35 = tpu.concatenate %33, %34 in 1 : vector<8x1xf32>, vector<8x127xf32> -> vector<8x128xf32>
    %c3 = arith.constant 3 : index
    %c0_19 = arith.constant 0 : index
    %c0_20 = arith.constant 0 : index
    %36 = vector.load %arg5[%c3, %c0_19, %c0_20] : memref<9x1x128xf32, #tpu.memory_space<vmem>>, vector<1x1x128xf32>
    %37 = vector.shape_cast %36 : vector<1x1x128xf32> to vector<1x128xf32>
    %38 = vector.broadcast %37 : vector<1x128xf32> to vector<8x128xf32>
    %39 = arith.mulf %35, %38 : vector<8x128xf32>
    %c3_21 = arith.constant 3 : index
    %c0_22 = arith.constant 0 : index
    %c0_23 = arith.constant 0 : index
    %40 = vector.load %arg3[%c3_21, %c0_22, %c0_23] : memref<9x16x8xf32, #tpu.memory_space<vmem>>, vector<1x16x8xf32>
    %41 = vector.shape_cast %40 : vector<1x16x8xf32> to vector<16x8xf32>
    %cst_24 = arith.constant dense<0.000000e+00> : vector<16x128xf32>
    %42 = tpu.matmul %41, %39, %cst_24 {dimension_numbers = #tpu.dot_dimension_numbers<[1], [0], [0], [1], [0, 0, 1, 1], [], []>} : vector<16x8xf32>, vector<8x128xf32>, vector<16x128xf32> -> vector<16x128xf32>
    %43 = arith.addf %32, %42 : vector<16x128xf32>
    %c4 = arith.constant 4 : index
    %c0_25 = arith.constant 0 : index
    %c0_26 = arith.constant 0 : index
    %44 = vector.load %arg3[%c4, %c0_25, %c0_26] : memref<9x16x8xf32, #tpu.memory_space<vmem>>, vector<1x16x8xf32>
    %45 = vector.shape_cast %44 : vector<1x16x8xf32> to vector<16x8xf32>
    %cst_27 = arith.constant dense<0.000000e+00> : vector<16x128xf32>
    %46 = tpu.matmul %45, %0, %cst_27 {dimension_numbers = #tpu.dot_dimension_numbers<[1], [0], [0], [1], [0, 0, 1, 1], [], []>} : vector<16x8xf32>, vector<8x128xf32>, vector<16x128xf32> -> vector<16x128xf32>
    %47 = arith.addf %43, %46 : vector<16x128xf32>
    %48 = vector.extract_strided_slice %0 {offsets = [0, 1], sizes = [8, 127], strides = [1, 1]} : vector<8x128xf32> to vector<8x127xf32>
    %49 = vector.extract_strided_slice %0 {offsets = [0, 0], sizes = [8, 1], strides = [1, 1]} : vector<8x128xf32> to vector<8x1xf32>
    %50 = tpu.concatenate %48, %49 in 1 : vector<8x127xf32>, vector<8x1xf32> -> vector<8x128xf32>
    %c5 = arith.constant 5 : index
    %c0_28 = arith.constant 0 : index
    %c0_29 = arith.constant 0 : index
    %51 = vector.load %arg5[%c5, %c0_28, %c0_29] : memref<9x1x128xf32, #tpu.memory_space<vmem>>, vector<1x1x128xf32>
    %52 = vector.shape_cast %51 : vector<1x1x128xf32> to vector<1x128xf32>
    %53 = vector.broadcast %52 : vector<1x128xf32> to vector<8x128xf32>
    %54 = arith.mulf %50, %53 : vector<8x128xf32>
    %c5_30 = arith.constant 5 : index
    %c0_31 = arith.constant 0 : index
    %c0_32 = arith.constant 0 : index
    %55 = vector.load %arg3[%c5_30, %c0_31, %c0_32] : memref<9x16x8xf32, #tpu.memory_space<vmem>>, vector<1x16x8xf32>
    %56 = vector.shape_cast %55 : vector<1x16x8xf32> to vector<16x8xf32>
    %cst_33 = arith.constant dense<0.000000e+00> : vector<16x128xf32>
    %57 = tpu.matmul %56, %54, %cst_33 {dimension_numbers = #tpu.dot_dimension_numbers<[1], [0], [0], [1], [0, 0, 1, 1], [], []>} : vector<16x8xf32>, vector<8x128xf32>, vector<16x128xf32> -> vector<16x128xf32>
    %58 = arith.addf %47, %57 : vector<16x128xf32>
    %59 = vector.extract_strided_slice %0 {offsets = [0, 7], sizes = [8, 121], strides = [1, 1]} : vector<8x128xf32> to vector<8x121xf32>
    %60 = vector.extract_strided_slice %0 {offsets = [0, 0], sizes = [8, 7], strides = [1, 1]} : vector<8x128xf32> to vector<8x7xf32>
    %61 = tpu.concatenate %59, %60 in 1 : vector<8x121xf32>, vector<8x7xf32> -> vector<8x128xf32>
    %c6 = arith.constant 6 : index
    %c0_34 = arith.constant 0 : index
    %c0_35 = arith.constant 0 : index
    %62 = vector.load %arg5[%c6, %c0_34, %c0_35] : memref<9x1x128xf32, #tpu.memory_space<vmem>>, vector<1x1x128xf32>
    %63 = vector.shape_cast %62 : vector<1x1x128xf32> to vector<1x128xf32>
    %64 = vector.broadcast %63 : vector<1x128xf32> to vector<8x128xf32>
    %65 = arith.mulf %61, %64 : vector<8x128xf32>
    %c6_36 = arith.constant 6 : index
    %c0_37 = arith.constant 0 : index
    %c0_38 = arith.constant 0 : index
    %66 = vector.load %arg3[%c6_36, %c0_37, %c0_38] : memref<9x16x8xf32, #tpu.memory_space<vmem>>, vector<1x16x8xf32>
    %67 = vector.shape_cast %66 : vector<1x16x8xf32> to vector<16x8xf32>
    %cst_39 = arith.constant dense<0.000000e+00> : vector<16x128xf32>
    %68 = tpu.matmul %67, %65, %cst_39 {dimension_numbers = #tpu.dot_dimension_numbers<[1], [0], [0], [1], [0, 0, 1, 1], [], []>} : vector<16x8xf32>, vector<8x128xf32>, vector<16x128xf32> -> vector<16x128xf32>
    %69 = arith.addf %58, %68 : vector<16x128xf32>
    %70 = vector.extract_strided_slice %0 {offsets = [0, 8], sizes = [8, 120], strides = [1, 1]} : vector<8x128xf32> to vector<8x120xf32>
    %71 = vector.extract_strided_slice %0 {offsets = [0, 0], sizes = [8, 8], strides = [1, 1]} : vector<8x128xf32> to vector<8x8xf32>
    %72 = tpu.concatenate %70, %71 in 1 : vector<8x120xf32>, vector<8x8xf32> -> vector<8x128xf32>
    %c7 = arith.constant 7 : index
    %c0_40 = arith.constant 0 : index
    %c0_41 = arith.constant 0 : index
    %73 = vector.load %arg5[%c7, %c0_40, %c0_41] : memref<9x1x128xf32, #tpu.memory_space<vmem>>, vector<1x1x128xf32>
    %74 = vector.shape_cast %73 : vector<1x1x128xf32> to vector<1x128xf32>
    %75 = vector.broadcast %74 : vector<1x128xf32> to vector<8x128xf32>
    %76 = arith.mulf %72, %75 : vector<8x128xf32>
    %c7_42 = arith.constant 7 : index
    %c0_43 = arith.constant 0 : index
    %c0_44 = arith.constant 0 : index
    %77 = vector.load %arg3[%c7_42, %c0_43, %c0_44] : memref<9x16x8xf32, #tpu.memory_space<vmem>>, vector<1x16x8xf32>
    %78 = vector.shape_cast %77 : vector<1x16x8xf32> to vector<16x8xf32>
    %cst_45 = arith.constant dense<0.000000e+00> : vector<16x128xf32>
    %79 = tpu.matmul %78, %76, %cst_45 {dimension_numbers = #tpu.dot_dimension_numbers<[1], [0], [0], [1], [0, 0, 1, 1], [], []>} : vector<16x8xf32>, vector<8x128xf32>, vector<16x128xf32> -> vector<16x128xf32>
    %80 = arith.addf %69, %79 : vector<16x128xf32>
    %81 = vector.extract_strided_slice %0 {offsets = [0, 9], sizes = [8, 119], strides = [1, 1]} : vector<8x128xf32> to vector<8x119xf32>
    %82 = vector.extract_strided_slice %0 {offsets = [0, 0], sizes = [8, 9], strides = [1, 1]} : vector<8x128xf32> to vector<8x9xf32>
    %83 = tpu.concatenate %81, %82 in 1 : vector<8x119xf32>, vector<8x9xf32> -> vector<8x128xf32>
    %c8 = arith.constant 8 : index
    %c0_46 = arith.constant 0 : index
    %c0_47 = arith.constant 0 : index
    %84 = vector.load %arg5[%c8, %c0_46, %c0_47] : memref<9x1x128xf32, #tpu.memory_space<vmem>>, vector<1x1x128xf32>
    %85 = vector.shape_cast %84 : vector<1x1x128xf32> to vector<1x128xf32>
    %86 = vector.broadcast %85 : vector<1x128xf32> to vector<8x128xf32>
    %87 = arith.mulf %83, %86 : vector<8x128xf32>
    %c8_48 = arith.constant 8 : index
    %c0_49 = arith.constant 0 : index
    %c0_50 = arith.constant 0 : index
    %88 = vector.load %arg3[%c8_48, %c0_49, %c0_50] : memref<9x16x8xf32, #tpu.memory_space<vmem>>, vector<1x16x8xf32>
    %89 = vector.shape_cast %88 : vector<1x16x8xf32> to vector<16x8xf32>
    %cst_51 = arith.constant dense<0.000000e+00> : vector<16x128xf32>
    %90 = tpu.matmul %89, %87, %cst_51 {dimension_numbers = #tpu.dot_dimension_numbers<[1], [0], [0], [1], [0, 0, 1, 1], [], []>} : vector<16x8xf32>, vector<8x128xf32>, vector<16x128xf32> -> vector<16x128xf32>
    %91 = arith.addf %80, %90 : vector<16x128xf32>
    %c0_52 = arith.constant 0 : index
    %c0_53 = arith.constant 0 : index
    %92 = vector.load %arg4[%c0_52, %c0_53] : memref<16x1xf32, #tpu.memory_space<vmem>>, vector<16x1xf32>
    %93 = vector.broadcast %92 : vector<16x1xf32> to vector<16x128xf32>
    %94 = arith.addf %91, %93 : vector<16x128xf32>
    %c0_54 = arith.constant 0 : index
    %c0_55 = arith.constant 0 : index
    %95 = vector.load %arg6[%c0_54, %c0_55] : memref<16x128xf32, #tpu.memory_space<vmem>>, vector<16x128xf32>
    tpu.vector_store %arg6[%c0_54, %c0_55], %94 {strides = array<i32>} : memref<16x128xf32, #tpu.memory_space<vmem>>, vector<16x128xf32>,
    return
  }
  func.func @transform_0(%arg0: i32, %arg1: i32) -> (i32, i32) {
    %c0_i32 = arith.constant 0 : i32
    %c0_i32_0 = arith.constant 0 : i32
    return %c0_i32, %arg1 : i32, i32
  }
  func.func @transform_1(%arg0: i32, %arg1: i32) -> (i32, i32, i32) {
    %c0_i32 = arith.constant 0 : i32
    %c0_i32_0 = arith.constant 0 : i32
    %c0_i32_1 = arith.constant 0 : i32
    return %c0_i32, %arg0, %c0_i32_0 : i32, i32, i32
  }
  func.func @transform_2(%arg0: i32, %arg1: i32) -> (i32, i32) {
    %c0_i32 = arith.constant 0 : i32
    %c0_i32_0 = arith.constant 0 : i32
    return %arg0, %c0_i32 : i32, i32
  }
  func.func @transform_3(%arg0: i32, %arg1: i32) -> (i32, i32, i32) {
    %c0_i32 = arith.constant 0 : i32
    %c0_i32_0 = arith.constant 0 : i32
    %c0_i32_1 = arith.constant 0 : i32
    return %c0_i32, %c0_i32_0, %arg1 : i32, i32, i32
  }
  func.func @transform_4(%arg0: i32, %arg1: i32) -> (i32, i32) {
    %c0_i32 = arith.constant 0 : i32
    return %arg0, %arg1 : i32, i32
  }
}

module attributes {stable_mosaic.version = 11 : i64} {
  func.func @_mod_conv_kernel(%arg0: i32, %arg1: i32, %arg2: memref<1xf32, #tpu.memory_space<smem>>, %arg3: memref<4x128xf32, #tpu.memory_space<vmem>>, %arg4: memref<4x128xf32, #tpu.memory_space<vmem>>, %arg5: memref<4x128xf32, #tpu.memory_space<vmem>>, %arg6: memref<4x64xf32, #tpu.memory_space<vmem>>, %arg7: memref<9x4x4xf32, #tpu.memory_space<vmem>>, %arg8: memref<4x1xf32, #tpu.memory_space<vmem>>, %arg9: memref<9x1x128xf32, #tpu.memory_space<vmem>>, %arg10: memref<4x128xf32, #tpu.memory_space<vmem>>, %arg11: memref<1x1x128xf32, #tpu.memory_space<vmem>>, %arg12: memref<1x1x128xf32, #tpu.memory_space<vmem>>) attributes {dimension_semantics = [#tpu.dimension_semantics<parallel>, #tpu.dimension_semantics<parallel>], iteration_bounds = array<i64: 1, 2>, scalar_prefetch = 0 : i64, scratch_operands = 0 : i64, tpu.core_type = #tpu.core_type<tc>, window_params = [{transform_indices = @transform_0, window_bounds = array<i64: 1>}, {transform_indices = @transform_1, window_bounds = array<i64: 4, 128>}, {transform_indices = @transform_2, window_bounds = array<i64: 4, 128>}, {transform_indices = @transform_3, window_bounds = array<i64: 4, 128>}, {pipeline_mode = #tpu.pipeline_mode<synchronous>, transform_indices = @transform_4, window_bounds = array<i64: 4, 64>}, {transform_indices = @transform_5, window_bounds = array<i64: 9, 4, 4>}, {transform_indices = @transform_6, window_bounds = array<i64: 4, 1>}, {transform_indices = @transform_7, window_bounds = array<i64: 9, 1, 128>}, {transform_indices = @transform_8, window_bounds = array<i64: 4, 128>}, {transform_indices = @transform_9, window_bounds = array<i64: 1, 1, 128>}, {transform_indices = @transform_10, window_bounds = array<i64: 1, 1, 128>}]} {
    %c0 = arith.constant 0 : index
    %0 = memref.load %arg2[%c0] : memref<1xf32, #tpu.memory_space<smem>>
    %c0_0 = arith.constant 0 : index
    %c0_1 = arith.constant 0 : index
    %1 = vector.load %arg3[%c0_0, %c0_1] : memref<4x128xf32, #tpu.memory_space<vmem>>, vector<4x128xf32>
    %c0_2 = arith.constant 0 : index
    %c0_3 = arith.constant 0 : index
    %2 = vector.load %arg6[%c0_2, %c0_3] : memref<4x64xf32, #tpu.memory_space<vmem>>, vector<4x64xf32>
    %3 = tpu.concatenate %2, %2 in 1 : vector<4x64xf32>, vector<4x64xf32> -> vector<4x128xf32>
    %c0_4 = arith.constant 0 : index
    %c0_5 = arith.constant 0 : index
    %4 = vector.load %arg4[%c0_4, %c0_5] : memref<4x128xf32, #tpu.memory_space<vmem>>, vector<4x128xf32>
    %5 = arith.subf %1, %3 : vector<4x128xf32>
    %6 = arith.mulf %4, %5 : vector<4x128xf32>
    %7 = vector.broadcast %0 : f32 to vector<4x128xf32>
    %8 = arith.mulf %6, %7 : vector<4x128xf32>
    %c0_6 = arith.constant 0 : index
    %c0_7 = arith.constant 0 : index
    %9 = vector.load %arg5[%c0_6, %c0_7] : memref<4x128xf32, #tpu.memory_space<vmem>>, vector<4x128xf32>
    %10 = arith.addf %8, %9 : vector<4x128xf32>
    %11 = vector.extract_strided_slice %10 {offsets = [0, 119], sizes = [4, 9], strides = [1, 1]} : vector<4x128xf32> to vector<4x9xf32>
    %12 = vector.extract_strided_slice %10 {offsets = [0, 0], sizes = [4, 119], strides = [1, 1]} : vector<4x128xf32> to vector<4x119xf32>
    %13 = tpu.concatenate %11, %12 in 1 : vector<4x9xf32>, vector<4x119xf32> -> vector<4x128xf32>
    %c0_8 = arith.constant 0 : index
    %c0_9 = arith.constant 0 : index
    %c0_10 = arith.constant 0 : index
    %14 = vector.load %arg9[%c0_8, %c0_9, %c0_10] : memref<9x1x128xf32, #tpu.memory_space<vmem>>, vector<1x1x128xf32>
    %15 = vector.shape_cast %14 : vector<1x1x128xf32> to vector<1x128xf32>
    %16 = vector.broadcast %15 : vector<1x128xf32> to vector<4x128xf32>
    %17 = arith.mulf %13, %16 : vector<4x128xf32>
    %c0_11 = arith.constant 0 : index
    %c0_12 = arith.constant 0 : index
    %c0_13 = arith.constant 0 : index
    %18 = vector.load %arg7[%c0_11, %c0_12, %c0_13] : memref<9x4x4xf32, #tpu.memory_space<vmem>>, vector<1x4x4xf32>
    %19 = vector.shape_cast %18 : vector<1x4x4xf32> to vector<4x4xf32>
    %cst = arith.constant dense<0.000000e+00> : vector<4x128xf32>
    %20 = tpu.matmul %19, %17, %cst {dimension_numbers = #tpu.dot_dimension_numbers<[1], [0], [0], [1], [0, 0, 1, 1], [], []>} : vector<4x4xf32>, vector<4x128xf32>, vector<4x128xf32> -> vector<4x128xf32>
    %21 = vector.extract_strided_slice %10 {offsets = [0, 120], sizes = [4, 8], strides = [1, 1]} : vector<4x128xf32> to vector<4x8xf32>
    %22 = vector.extract_strided_slice %10 {offsets = [0, 0], sizes = [4, 120], strides = [1, 1]} : vector<4x128xf32> to vector<4x120xf32>
    %23 = tpu.concatenate %21, %22 in 1 : vector<4x8xf32>, vector<4x120xf32> -> vector<4x128xf32>
    %c1 = arith.constant 1 : index
    %c0_14 = arith.constant 0 : index
    %c0_15 = arith.constant 0 : index
    %24 = vector.load %arg9[%c1, %c0_14, %c0_15] : memref<9x1x128xf32, #tpu.memory_space<vmem>>, vector<1x1x128xf32>
    %25 = vector.shape_cast %24 : vector<1x1x128xf32> to vector<1x128xf32>
    %26 = vector.broadcast %25 : vector<1x128xf32> to vector<4x128xf32>
    %27 = arith.mulf %23, %26 : vector<4x128xf32>
    %c1_16 = arith.constant 1 : index
    %c0_17 = arith.constant 0 : index
    %c0_18 = arith.constant 0 : index
    %28 = vector.load %arg7[%c1_16, %c0_17, %c0_18] : memref<9x4x4xf32, #tpu.memory_space<vmem>>, vector<1x4x4xf32>
    %29 = vector.shape_cast %28 : vector<1x4x4xf32> to vector<4x4xf32>
    %cst_19 = arith.constant dense<0.000000e+00> : vector<4x128xf32>
    %30 = tpu.matmul %29, %27, %cst_19 {dimension_numbers = #tpu.dot_dimension_numbers<[1], [0], [0], [1], [0, 0, 1, 1], [], []>} : vector<4x4xf32>, vector<4x128xf32>, vector<4x128xf32> -> vector<4x128xf32>
    %31 = arith.addf %20, %30 : vector<4x128xf32>
    %32 = vector.extract_strided_slice %10 {offsets = [0, 121], sizes = [4, 7], strides = [1, 1]} : vector<4x128xf32> to vector<4x7xf32>
    %33 = vector.extract_strided_slice %10 {offsets = [0, 0], sizes = [4, 121], strides = [1, 1]} : vector<4x128xf32> to vector<4x121xf32>
    %34 = tpu.concatenate %32, %33 in 1 : vector<4x7xf32>, vector<4x121xf32> -> vector<4x128xf32>
    %c2 = arith.constant 2 : index
    %c0_20 = arith.constant 0 : index
    %c0_21 = arith.constant 0 : index
    %35 = vector.load %arg9[%c2, %c0_20, %c0_21] : memref<9x1x128xf32, #tpu.memory_space<vmem>>, vector<1x1x128xf32>
    %36 = vector.shape_cast %35 : vector<1x1x128xf32> to vector<1x128xf32>
    %37 = vector.broadcast %36 : vector<1x128xf32> to vector<4x128xf32>
    %38 = arith.mulf %34, %37 : vector<4x128xf32>
    %c2_22 = arith.constant 2 : index
    %c0_23 = arith.constant 0 : index
    %c0_24 = arith.constant 0 : index
    %39 = vector.load %arg7[%c2_22, %c0_23, %c0_24] : memref<9x4x4xf32, #tpu.memory_space<vmem>>, vector<1x4x4xf32>
    %40 = vector.shape_cast %39 : vector<1x4x4xf32> to vector<4x4xf32>
    %cst_25 = arith.constant dense<0.000000e+00> : vector<4x128xf32>
    %41 = tpu.matmul %40, %38, %cst_25 {dimension_numbers = #tpu.dot_dimension_numbers<[1], [0], [0], [1], [0, 0, 1, 1], [], []>} : vector<4x4xf32>, vector<4x128xf32>, vector<4x128xf32> -> vector<4x128xf32>
    %42 = arith.addf %31, %41 : vector<4x128xf32>
    %43 = vector.extract_strided_slice %10 {offsets = [0, 127], sizes = [4, 1], strides = [1, 1]} : vector<4x128xf32> to vector<4x1xf32>
    %44 = vector.extract_strided_slice %10 {offsets = [0, 0], sizes = [4, 127], strides = [1, 1]} : vector<4x128xf32> to vector<4x127xf32>
    %45 = tpu.concatenate %43, %44 in 1 : vector<4x1xf32>, vector<4x127xf32> -> vector<4x128xf32>
    %c3 = arith.constant 3 : index
    %c0_26 = arith.constant 0 : index
    %c0_27 = arith.constant 0 : index
    %46 = vector.load %arg9[%c3, %c0_26, %c0_27] : memref<9x1x128xf32, #tpu.memory_space<vmem>>, vector<1x1x128xf32>
    %47 = vector.shape_cast %46 : vector<1x1x128xf32> to vector<1x128xf32>
    %48 = vector.broadcast %47 : vector<1x128xf32> to vector<4x128xf32>
    %49 = arith.mulf %45, %48 : vector<4x128xf32>
    %c3_28 = arith.constant 3 : index
    %c0_29 = arith.constant 0 : index
    %c0_30 = arith.constant 0 : index
    %50 = vector.load %arg7[%c3_28, %c0_29, %c0_30] : memref<9x4x4xf32, #tpu.memory_space<vmem>>, vector<1x4x4xf32>
    %51 = vector.shape_cast %50 : vector<1x4x4xf32> to vector<4x4xf32>
    %cst_31 = arith.constant dense<0.000000e+00> : vector<4x128xf32>
    %52 = tpu.matmul %51, %49, %cst_31 {dimension_numbers = #tpu.dot_dimension_numbers<[1], [0], [0], [1], [0, 0, 1, 1], [], []>} : vector<4x4xf32>, vector<4x128xf32>, vector<4x128xf32> -> vector<4x128xf32>
    %53 = arith.addf %42, %52 : vector<4x128xf32>
    %c4 = arith.constant 4 : index
    %c0_32 = arith.constant 0 : index
    %c0_33 = arith.constant 0 : index
    %54 = vector.load %arg7[%c4, %c0_32, %c0_33] : memref<9x4x4xf32, #tpu.memory_space<vmem>>, vector<1x4x4xf32>
    %55 = vector.shape_cast %54 : vector<1x4x4xf32> to vector<4x4xf32>
    %cst_34 = arith.constant dense<0.000000e+00> : vector<4x128xf32>
    %56 = tpu.matmul %55, %10, %cst_34 {dimension_numbers = #tpu.dot_dimension_numbers<[1], [0], [0], [1], [0, 0, 1, 1], [], []>} : vector<4x4xf32>, vector<4x128xf32>, vector<4x128xf32> -> vector<4x128xf32>
    %57 = arith.addf %53, %56 : vector<4x128xf32>
    %58 = vector.extract_strided_slice %10 {offsets = [0, 1], sizes = [4, 127], strides = [1, 1]} : vector<4x128xf32> to vector<4x127xf32>
    %59 = vector.extract_strided_slice %10 {offsets = [0, 0], sizes = [4, 1], strides = [1, 1]} : vector<4x128xf32> to vector<4x1xf32>
    %60 = tpu.concatenate %58, %59 in 1 : vector<4x127xf32>, vector<4x1xf32> -> vector<4x128xf32>
    %c5 = arith.constant 5 : index
    %c0_35 = arith.constant 0 : index
    %c0_36 = arith.constant 0 : index
    %61 = vector.load %arg9[%c5, %c0_35, %c0_36] : memref<9x1x128xf32, #tpu.memory_space<vmem>>, vector<1x1x128xf32>
    %62 = vector.shape_cast %61 : vector<1x1x128xf32> to vector<1x128xf32>
    %63 = vector.broadcast %62 : vector<1x128xf32> to vector<4x128xf32>
    %64 = arith.mulf %60, %63 : vector<4x128xf32>
    %c5_37 = arith.constant 5 : index
    %c0_38 = arith.constant 0 : index
    %c0_39 = arith.constant 0 : index
    %65 = vector.load %arg7[%c5_37, %c0_38, %c0_39] : memref<9x4x4xf32, #tpu.memory_space<vmem>>, vector<1x4x4xf32>
    %66 = vector.shape_cast %65 : vector<1x4x4xf32> to vector<4x4xf32>
    %cst_40 = arith.constant dense<0.000000e+00> : vector<4x128xf32>
    %67 = tpu.matmul %66, %64, %cst_40 {dimension_numbers = #tpu.dot_dimension_numbers<[1], [0], [0], [1], [0, 0, 1, 1], [], []>} : vector<4x4xf32>, vector<4x128xf32>, vector<4x128xf32> -> vector<4x128xf32>
    %68 = arith.addf %57, %67 : vector<4x128xf32>
    %69 = vector.extract_strided_slice %10 {offsets = [0, 7], sizes = [4, 121], strides = [1, 1]} : vector<4x128xf32> to vector<4x121xf32>
    %70 = vector.extract_strided_slice %10 {offsets = [0, 0], sizes = [4, 7], strides = [1, 1]} : vector<4x128xf32> to vector<4x7xf32>
    %71 = tpu.concatenate %69, %70 in 1 : vector<4x121xf32>, vector<4x7xf32> -> vector<4x128xf32>
    %c6 = arith.constant 6 : index
    %c0_41 = arith.constant 0 : index
    %c0_42 = arith.constant 0 : index
    %72 = vector.load %arg9[%c6, %c0_41, %c0_42] : memref<9x1x128xf32, #tpu.memory_space<vmem>>, vector<1x1x128xf32>
    %73 = vector.shape_cast %72 : vector<1x1x128xf32> to vector<1x128xf32>
    %74 = vector.broadcast %73 : vector<1x128xf32> to vector<4x128xf32>
    %75 = arith.mulf %71, %74 : vector<4x128xf32>
    %c6_43 = arith.constant 6 : index
    %c0_44 = arith.constant 0 : index
    %c0_45 = arith.constant 0 : index
    %76 = vector.load %arg7[%c6_43, %c0_44, %c0_45] : memref<9x4x4xf32, #tpu.memory_space<vmem>>, vector<1x4x4xf32>
    %77 = vector.shape_cast %76 : vector<1x4x4xf32> to vector<4x4xf32>
    %cst_46 = arith.constant dense<0.000000e+00> : vector<4x128xf32>
    %78 = tpu.matmul %77, %75, %cst_46 {dimension_numbers = #tpu.dot_dimension_numbers<[1], [0], [0], [1], [0, 0, 1, 1], [], []>} : vector<4x4xf32>, vector<4x128xf32>, vector<4x128xf32> -> vector<4x128xf32>
    %79 = arith.addf %68, %78 : vector<4x128xf32>
    %80 = vector.extract_strided_slice %10 {offsets = [0, 8], sizes = [4, 120], strides = [1, 1]} : vector<4x128xf32> to vector<4x120xf32>
    %81 = vector.extract_strided_slice %10 {offsets = [0, 0], sizes = [4, 8], strides = [1, 1]} : vector<4x128xf32> to vector<4x8xf32>
    %82 = tpu.concatenate %80, %81 in 1 : vector<4x120xf32>, vector<4x8xf32> -> vector<4x128xf32>
    %c7 = arith.constant 7 : index
    %c0_47 = arith.constant 0 : index
    %c0_48 = arith.constant 0 : index
    %83 = vector.load %arg9[%c7, %c0_47, %c0_48] : memref<9x1x128xf32, #tpu.memory_space<vmem>>, vector<1x1x128xf32>
    %84 = vector.shape_cast %83 : vector<1x1x128xf32> to vector<1x128xf32>
    %85 = vector.broadcast %84 : vector<1x128xf32> to vector<4x128xf32>
    %86 = arith.mulf %82, %85 : vector<4x128xf32>
    %c7_49 = arith.constant 7 : index
    %c0_50 = arith.constant 0 : index
    %c0_51 = arith.constant 0 : index
    %87 = vector.load %arg7[%c7_49, %c0_50, %c0_51] : memref<9x4x4xf32, #tpu.memory_space<vmem>>, vector<1x4x4xf32>
    %88 = vector.shape_cast %87 : vector<1x4x4xf32> to vector<4x4xf32>
    %cst_52 = arith.constant dense<0.000000e+00> : vector<4x128xf32>
    %89 = tpu.matmul %88, %86, %cst_52 {dimension_numbers = #tpu.dot_dimension_numbers<[1], [0], [0], [1], [0, 0, 1, 1], [], []>} : vector<4x4xf32>, vector<4x128xf32>, vector<4x128xf32> -> vector<4x128xf32>
    %90 = arith.addf %79, %89 : vector<4x128xf32>
    %91 = vector.extract_strided_slice %10 {offsets = [0, 9], sizes = [4, 119], strides = [1, 1]} : vector<4x128xf32> to vector<4x119xf32>
    %92 = vector.extract_strided_slice %10 {offsets = [0, 0], sizes = [4, 9], strides = [1, 1]} : vector<4x128xf32> to vector<4x9xf32>
    %93 = tpu.concatenate %91, %92 in 1 : vector<4x119xf32>, vector<4x9xf32> -> vector<4x128xf32>
    %c8 = arith.constant 8 : index
    %c0_53 = arith.constant 0 : index
    %c0_54 = arith.constant 0 : index
    %94 = vector.load %arg9[%c8, %c0_53, %c0_54] : memref<9x1x128xf32, #tpu.memory_space<vmem>>, vector<1x1x128xf32>
    %95 = vector.shape_cast %94 : vector<1x1x128xf32> to vector<1x128xf32>
    %96 = vector.broadcast %95 : vector<1x128xf32> to vector<4x128xf32>
    %97 = arith.mulf %93, %96 : vector<4x128xf32>
    %c8_55 = arith.constant 8 : index
    %c0_56 = arith.constant 0 : index
    %c0_57 = arith.constant 0 : index
    %98 = vector.load %arg7[%c8_55, %c0_56, %c0_57] : memref<9x4x4xf32, #tpu.memory_space<vmem>>, vector<1x4x4xf32>
    %99 = vector.shape_cast %98 : vector<1x4x4xf32> to vector<4x4xf32>
    %cst_58 = arith.constant dense<0.000000e+00> : vector<4x128xf32>
    %100 = tpu.matmul %99, %97, %cst_58 {dimension_numbers = #tpu.dot_dimension_numbers<[1], [0], [0], [1], [0, 0, 1, 1], [], []>} : vector<4x4xf32>, vector<4x128xf32>, vector<4x128xf32> -> vector<4x128xf32>
    %101 = arith.addf %90, %100 : vector<4x128xf32>
    %c0_59 = arith.constant 0 : index
    %c0_60 = arith.constant 0 : index
    %102 = vector.load %arg8[%c0_59, %c0_60] : memref<4x1xf32, #tpu.memory_space<vmem>>, vector<4x1xf32>
    %103 = vector.broadcast %102 : vector<4x1xf32> to vector<4x128xf32>
    %104 = arith.addf %101, %103 : vector<4x128xf32>
    %cst_61 = arith.constant 0.000000e+00 : f32
    %105 = vector.broadcast %cst_61 : f32 to vector<4x128xf32>
    %106 = arith.cmpf oge, %104, %105 : vector<4x128xf32>
    %cst_62 = arith.constant 0.00999999977 : f32
    %107 = vector.broadcast %cst_62 : f32 to vector<4x128xf32>
    %108 = arith.mulf %107, %104 : vector<4x128xf32>
    %109 = arith.select %106, %104, %108 : vector<4x128xi1>, vector<4x128xf32>
    %c0_63 = arith.constant 0 : index
    %c0_64 = arith.constant 0 : index
    %110 = vector.load %arg10[%c0_63, %c0_64] : memref<4x128xf32, #tpu.memory_space<vmem>>, vector<4x128xf32>
    tpu.vector_store %arg10[%c0_63, %c0_64], %109 {strides = array<i32>} : memref<4x128xf32, #tpu.memory_space<vmem>>, vector<4x128xf32>,
    %cst_65 = arith.constant dense<0.000000e+00> : vector<128xf32>
    %111 = vector.multi_reduction <add>, %109, %cst_65 [0] : vector<4x128xf32> to vector<128xf32>
    %112 = vector.shape_cast %111 : vector<128xf32> to vector<1x128xf32>
    %c0_66 = arith.constant 0 : index
    %c0_67 = arith.constant 0 : index
    %c0_68 = arith.constant 0 : index
    %113 = vector.load %arg11[%c0_66, %c0_67, %c0_68] : memref<1x1x128xf32, #tpu.memory_space<vmem>>, vector<1x1x128xf32>
    %114 = vector.shape_cast %113 : vector<1x1x128xf32> to vector<1x128xf32>
    %115 = vector.shape_cast %112 : vector<1x128xf32> to vector<1x1x128xf32>
    tpu.vector_store %arg11[%c0_66, %c0_67, %c0_68], %115 {strides = array<i32>} : memref<1x1x128xf32, #tpu.memory_space<vmem>>, vector<1x1x128xf32>,
    %116 = arith.mulf %109, %109 : vector<4x128xf32>
    %cst_69 = arith.constant dense<0.000000e+00> : vector<128xf32>
    %117 = vector.multi_reduction <add>, %116, %cst_69 [0] : vector<4x128xf32> to vector<128xf32>
    %118 = vector.shape_cast %117 : vector<128xf32> to vector<1x128xf32>
    %c0_70 = arith.constant 0 : index
    %c0_71 = arith.constant 0 : index
    %c0_72 = arith.constant 0 : index
    %119 = vector.load %arg12[%c0_70, %c0_71, %c0_72] : memref<1x1x128xf32, #tpu.memory_space<vmem>>, vector<1x1x128xf32>
    %120 = vector.shape_cast %119 : vector<1x1x128xf32> to vector<1x128xf32>
    %121 = vector.shape_cast %118 : vector<1x128xf32> to vector<1x1x128xf32>
    tpu.vector_store %arg12[%c0_70, %c0_71, %c0_72], %121 {strides = array<i32>} : memref<1x1x128xf32, #tpu.memory_space<vmem>>, vector<1x1x128xf32>,
    return
  }
  func.func @transform_0(%arg0: i32, %arg1: i32) -> i32 {
    %c0_i32 = arith.constant 0 : i32
    %c0_i32_0 = arith.constant 0 : i32
    return %c0_i32 : i32
  }
  func.func @transform_1(%arg0: i32, %arg1: i32) -> (i32, i32) {
    %c0_i32 = arith.constant 0 : i32
    %c0_i32_0 = arith.constant 0 : i32
    return %c0_i32, %arg1 : i32, i32
  }
  func.func @transform_2(%arg0: i32, %arg1: i32) -> (i32, i32) {
    %c0_i32 = arith.constant 0 : i32
    %c0_i32_0 = arith.constant 0 : i32
    return %c0_i32, %arg1 : i32, i32
  }
  func.func @transform_3(%arg0: i32, %arg1: i32) -> (i32, i32) {
    %c0_i32 = arith.constant 0 : i32
    %c0_i32_0 = arith.constant 0 : i32
    return %c0_i32, %arg1 : i32, i32
  }
  func.func @transform_4(%arg0: i32, %arg1: i32) -> (i32, i32) {
    %c0_i32 = arith.constant 0 : i32
    %c0_i32_0 = arith.constant 0 : i32
    %c0_i32_1 = arith.constant 0 : i32
    return %c0_i32, %c0_i32_0 : i32, i32
  }
  func.func @transform_5(%arg0: i32, %arg1: i32) -> (i32, i32, i32) {
    %c0_i32 = arith.constant 0 : i32
    %c0_i32_0 = arith.constant 0 : i32
    %c0_i32_1 = arith.constant 0 : i32
    return %c0_i32, %arg0, %c0_i32_0 : i32, i32, i32
  }
  func.func @transform_6(%arg0: i32, %arg1: i32) -> (i32, i32) {
    %c0_i32 = arith.constant 0 : i32
    %c0_i32_0 = arith.constant 0 : i32
    return %arg0, %c0_i32 : i32, i32
  }
  func.func @transform_7(%arg0: i32, %arg1: i32) -> (i32, i32, i32) {
    %c0_i32 = arith.constant 0 : i32
    %c0_i32_0 = arith.constant 0 : i32
    %c0_i32_1 = arith.constant 0 : i32
    return %c0_i32, %c0_i32_0, %arg1 : i32, i32, i32
  }
  func.func @transform_8(%arg0: i32, %arg1: i32) -> (i32, i32) {
    %c0_i32 = arith.constant 0 : i32
    return %arg0, %arg1 : i32, i32
  }
  func.func @transform_9(%arg0: i32, %arg1: i32) -> (i32, i32, i32) {
    %c0_i32 = arith.constant 0 : i32
    %c0_i32_0 = arith.constant 0 : i32
    return %arg0, %c0_i32, %arg1 : i32, i32, i32
  }
  func.func @transform_10(%arg0: i32, %arg1: i32) -> (i32, i32, i32) {
    %c0_i32 = arith.constant 0 : i32
    %c0_i32_0 = arith.constant 0 : i32
    return %arg0, %c0_i32, %arg1 : i32, i32, i32
  }
}

module attributes {stable_mosaic.version = 11 : i64} {
  func.func @_adain_kernel(%arg0: i32, %arg1: memref<1xf32, #tpu.memory_space<smem>>, %arg2: memref<4x128xf32, #tpu.memory_space<vmem>>, %arg3: memref<4x128xf32, #tpu.memory_space<vmem>>, %arg4: memref<4x128xf32, #tpu.memory_space<vmem>>, %arg5: memref<4x64xf32, #tpu.memory_space<vmem>>, %arg6: memref<4x128xf32, #tpu.memory_space<vmem>>) attributes {dimension_semantics = [#tpu.dimension_semantics<parallel>], iteration_bounds = array<i64: 2>, scalar_prefetch = 0 : i64, scratch_operands = 0 : i64, tpu.core_type = #tpu.core_type<tc>, window_params = [{transform_indices = @transform_0, window_bounds = array<i64: 1>}, {transform_indices = @transform_1, window_bounds = array<i64: 4, 128>}, {transform_indices = @transform_2, window_bounds = array<i64: 4, 128>}, {transform_indices = @transform_3, window_bounds = array<i64: 4, 128>}, {pipeline_mode = #tpu.pipeline_mode<synchronous>, transform_indices = @transform_4, window_bounds = array<i64: 4, 64>}, {transform_indices = @transform_5, window_bounds = array<i64: 4, 128>}]} {
    %c0 = arith.constant 0 : index
    %0 = memref.load %arg1[%c0] : memref<1xf32, #tpu.memory_space<smem>>
    %c0_0 = arith.constant 0 : index
    %c0_1 = arith.constant 0 : index
    %1 = vector.load %arg2[%c0_0, %c0_1] : memref<4x128xf32, #tpu.memory_space<vmem>>, vector<4x128xf32>
    %c0_2 = arith.constant 0 : index
    %c0_3 = arith.constant 0 : index
    %2 = vector.load %arg5[%c0_2, %c0_3] : memref<4x64xf32, #tpu.memory_space<vmem>>, vector<4x64xf32>
    %3 = tpu.concatenate %2, %2 in 1 : vector<4x64xf32>, vector<4x64xf32> -> vector<4x128xf32>
    %c0_4 = arith.constant 0 : index
    %c0_5 = arith.constant 0 : index
    %4 = vector.load %arg3[%c0_4, %c0_5] : memref<4x128xf32, #tpu.memory_space<vmem>>, vector<4x128xf32>
    %5 = arith.subf %1, %3 : vector<4x128xf32>
    %6 = arith.mulf %4, %5 : vector<4x128xf32>
    %7 = vector.broadcast %0 : f32 to vector<4x128xf32>
    %8 = arith.mulf %6, %7 : vector<4x128xf32>
    %c0_6 = arith.constant 0 : index
    %c0_7 = arith.constant 0 : index
    %9 = vector.load %arg4[%c0_6, %c0_7] : memref<4x128xf32, #tpu.memory_space<vmem>>, vector<4x128xf32>
    %10 = arith.addf %8, %9 : vector<4x128xf32>
    %c0_8 = arith.constant 0 : index
    %c0_9 = arith.constant 0 : index
    %11 = vector.load %arg6[%c0_8, %c0_9] : memref<4x128xf32, #tpu.memory_space<vmem>>, vector<4x128xf32>
    tpu.vector_store %arg6[%c0_8, %c0_9], %10 {strides = array<i32>} : memref<4x128xf32, #tpu.memory_space<vmem>>, vector<4x128xf32>,
    return
  }
  func.func @transform_0(%arg0: i32) -> i32 {
    %c0_i32 = arith.constant 0 : i32
    %c0_i32_0 = arith.constant 0 : i32
    return %c0_i32 : i32
  }
  func.func @transform_1(%arg0: i32) -> (i32, i32) {
    %c0_i32 = arith.constant 0 : i32
    %c0_i32_0 = arith.constant 0 : i32
    return %c0_i32, %arg0 : i32, i32
  }
  func.func @transform_2(%arg0: i32) -> (i32, i32) {
    %c0_i32 = arith.constant 0 : i32
    %c0_i32_0 = arith.constant 0 : i32
    return %c0_i32, %arg0 : i32, i32
  }
  func.func @transform_3(%arg0: i32) -> (i32, i32) {
    %c0_i32 = arith.constant 0 : i32
    %c0_i32_0 = arith.constant 0 : i32
    return %c0_i32, %arg0 : i32, i32
  }
  func.func @transform_4(%arg0: i32) -> (i32, i32) {
    %c0_i32 = arith.constant 0 : i32
    %c0_i32_0 = arith.constant 0 : i32
    %c0_i32_1 = arith.constant 0 : i32
    return %c0_i32, %c0_i32_0 : i32, i32
  }
  func.func @transform_5(%arg0: i32) -> (i32, i32) {
    %c0_i32 = arith.constant 0 : i32
    %c0_i32_0 = arith.constant 0 : i32
    return %c0_i32, %arg0 : i32, i32
  }
}

</mosaic_0001>

<bundles_post_ra>
// kernel: a_call__.5
= control target key start
LH: loop header
LB: loop body
LE: loop exit
PB: predicated region body
PF: predicated region fallthrough
CT: control target
= control target key end

     0   :  { %s431_s15 = smov 0   ;;  %s465_s0 = inlined_call_operand.vmem [shape: f32[4,256], index: 0, kind: input, shape index: {}]   ;;  %s466_s1 = inlined_call_operand.vmem [shape: f32[4,256], index: 1, kind: input, shape index: {}]   ;;  %s467_s2 = inlined_call_operand.vmem [shape: f32[4,256], index: 2, kind: output, shape index: {0}]   ;;  %s468_s3 = inlined_call_operand.vmem [shape: f32[1,256], index: 3, kind: output, shape index: {1}]   ;;  %s469_s4 = inlined_call_operand.vmem [shape: f32[1,256], index: 4, kind: output, shape index: {2}]  }
   0x1 LB: > { %s378_s16 = sadd.s32 4294967295, %s404_s15   ;;  %p382_p0 = scmp.ge.s32.totalorder %s404_s15, 1  ;;  %s404_s15 = sphi %s431_s15, %s15_s15  }
   0x2   : > { %p175_p1 = scmp.lt.s32.totalorder %s404_s15, 3 }
   0x4   : > { %p176_p2 = pnand %p382_p0, %p175_p1 }
   0x5   : > { %p209_p3 = scmp.lt.s32.totalorder (!%p176_p2), %s378_s16, 1 }
   0x6   : > { %179 = sbr.rel (%p176_p2) target bundleno = 68 (0x44), region = 28 }
   0xb   : > { %s471_s16 = smov (!%p209_p3, %s378_s16), 1  ;;  %vm229_vm0 = vcmask 1043456  }
   0xc   : > { %s383_s17 = sshll.u32 %s471_s16, 2  ;;  %s223_s29 = scalar_lea.vmem %s468_s3, %s471_s16 }
   0xd   : > { %s212_s20 = scalar_lea.vmem %s465_s0, %s383_s17  ;;  %s216_s23 = scalar_lea.vmem %s466_s1, %s383_s17 }
   0xe   : > { %v227_v0 = vld [vmem:[%s212_s20] sm:$0xf]  ;;  %s220_s26 = scalar_lea.vmem %s467_s2, %s383_s17  ;;  %s226_s6 = scalar_lea.vmem %s469_s4, %s471_s16 }
   0xf   : > { %v228_v1 = vmul.f32 %v227_v0, %v227_v0  ;;  %v242_v12 = vld [vmem:[%s216_s23] sm:$0xf] }
  0x11   : > { %v230_v2 = vsel %vm229_vm0, %v228_v1, 0.0 }
  0x12   : > { %v231_v3 = vrot.slane %v230_v2, 4 }
  0x14   : > { %v232_v4 = vadd.f32 %v231_v3, %v230_v2 }
  0x16   : > { %v233_v5 = vrot.slane %v232_v4, 2 }
  0x18   : > { %v234_v6 = vadd.f32 %v233_v5, %v232_v4 }
  0x1a   : > { %v235_v7 = vrot.slane %v234_v6, 1 }
  0x1c   : > { %v236_v8 = vadd.f32 %v235_v7, %v234_v6 }
  0x1e   : > { %v238_v9 = vmul.f32 0.25, %v236_v8 }
  0x20   : > { %v239_v10 = vadd.f32 1e-08, %v238_v9 }
  0x22   : > { %396 = vrsqrt.f32 %v239_v10 }
  0x2f   : > { %v397_v11 = vpop.eup %396 }
  0x30   : > { %v241_v13 = vmul.f32 %v397_v11, %v227_v0 }
  0x32   : > { %v243_v14 = vadd.f32 %v242_v12, %v241_v13 }
  0x34   : > { %244 = vst [vmem:[%s220_s26] sm:$0xf] %v243_v14  ;;  %v245_v15 = vsel %vm229_vm0, %v243_v14, 0.0  ;;  %v254_v16 = vmul.f32 %v243_v14, %v243_v14 }
  0x35   : > { %v246_v17 = vrot.slane %v245_v15, 4 }
  0x36   : > { %v255_v18 = vsel %vm229_vm0, %v254_v16, 0.0 }
  0x37   : > { %v247_v19 = vadd.f32 %v246_v17, %v245_v15  ;;  %v256_v20 = vrot.slane %v255_v18, 4 }
  0x39   : > { %v248_v21 = vrot.slane %v247_v19, 2  ;;  %v257_v22 = vadd.f32 %v256_v20, %v255_v18 }
  0x3b   : > { %v249_v23 = vadd.f32 %v248_v21, %v247_v19  ;;  %v258_v24 = vrot.slane %v257_v22, 2 }
  0x3d   : > { %v250_v25 = vrot.slane %v249_v23, 1  ;;  %v259_v26 = vadd.f32 %v258_v24, %v257_v22 }
  0x3f   : > { %v251_v27 = vadd.f32 %v250_v25, %v249_v23  ;;  %v260_v28 = vrot.slane %v259_v26, 1 }
  0x41   : > { %v252_v29 = vmul.f32 0.25, %v251_v27  ;;  %v261_v30 = vadd.f32 %v260_v28, %v259_v26 }
  0x43   : > { %253 = vst [vmem:[%s223_s29] sm:$0x1] %v252_v29  ;;  %262 = vst [vmem:[%s226_s6] sm:$0x1] %v261_v30 }
  0x44 PF: > { %s15_s15 = sadd.s32 1, %s404_s15  }
  0x45   : > { %p12_p4 = scmp.ge.s32.totalorder %s15_s15, 4  }
  0x47   :  { %14 = sbr.rel (!%p12_p4) target bundleno = 1 (0x1), region = 85 }

// kernel: a_call__.4
= control target key start
LH: loop header
LB: loop body
LE: loop exit
PB: predicated region body
PF: predicated region fallthrough
CT: control target
= control target key end

     0   :  { %s1643_s15 = smov 0   ;;  %s1645_s16 = smov 0   ;;  %s1824_s0 = inlined_call_operand.vmem [shape: f32[8,256], index: 0, kind: input, shape index: {}]   ;;  %s1825_s1 = inlined_call_operand.vmem [shape: f32[9,16,8], index: 1, kind: input, shape index: {}]   ;;  %s1826_s2 = inlined_call_operand.vmem [shape: f32[16,1], index: 2, kind: input, shape index: {}]   ;;  %s1827_s3 = inlined_call_operand.vmem [shape: f32[9,1,256], index: 3, kind: input, shape index: {}]   ;;  %s1828_s4 = inlined_call_operand.vmem [shape: f32[16,256], index: 4, kind: output, shape index: {}]  }
   0x1   :  { %s1647_s17 = smov 0   ;;  %s1649_s18 = smov 0  }
   0x2   :  { %s1651_s19 = smov 0  }
   0x3 LB: > { %s23_s20 = sadd.s32 1, %s1603_s18  ;;  %s1382_s21 = sadd.s32 4294967295, %s1607_s19   ;;  %s1607_s19 = sphi %s1651_s19, %s14_s19   ;;  %s1603_s18 = sphi %s1649_s18, %s1833_s18   ;;  %s1599_s17 = sphi %s1647_s17, %s1832_s17   ;;  %s1595_s16 = sphi %s1645_s16, %s1831_s16   ;;  %s1591_s15 = sphi %s1643_s15, %s1830_s15  }
   0x4   : > { %p24_p0 = scmp.ge.s32.totalorder %s23_s20, 2  ;;  %p118_p1 = scmp.ne.s32.totalorder %s1595_s16, %s1591_s15 }
   0x5   : > { %p119_p2 = scmp.eq.s32.totalorder %s1607_s19, 0  ;;  %p150_p4 = scmp.eq.s32.totalorder %s1382_s21, 1 }
   0x6   : > { %s1835_s20 = smov (%p24_p0, %s23_s20), 0  ;;  %s111_s23 = sadd.s32 1, %s1595_s16 }
   0x7   : > { %p120_p3 = por %p119_p2, %p118_p1  ;;  %s108_s22 = ssub.s32 %s1603_s18, %s1835_s20 }
   0x8   : > { %p109_p5 = scmp.eq.s32.totalorder %s108_s22, 0  ;;  %p1678_p6 = por %p150_p4, %p118_p1 }
   0x9   : > { %p1387_p7 = scmp.ge.s32.totalorder %s1607_s19, 2 }
   0xa   : > { %s1683_s25 = scalar_select %p109_p5, %s1595_s16, %s111_s23  }
   0xb   : > { %190 = sbr.rel (%p1387_p7) target bundleno = 26 (0x1a), region = 24 }
  0x10   : > { %200 = sbr.rel (!%p120_p3) target bundleno = 26 (0x1a), region = 32  ;;  %s202_s26 = sand.u32 (%p120_p3), 1, %s1595_s16  }
  0x11   : > { %s205_s29 = scalar_lea.vmem (%p120_p3), %s1827_s3, %s1603_s18  ;;  %s1516_s30 = smul.u32 (%p120_p3), 9, %s202_s26 }
  0x12   : > { %v222_v0 = vld [vmem:[%s205_s29] sm:$0x1] (%p120_p3)  ;;  %v224_v1 = vld [vmem:[%s205_s29 + $0x2] sm:$0x1] (%p120_p3)  ;;  %v226_v2 = vld [vmem:[%s205_s29 + $0x4] sm:$0x1] (%p120_p3) }
  0x13   : > { %v228_v3 = vld [vmem:[%s205_s29 + $0x6] sm:$0x1] (%p120_p3)  ;;  %v230_v4 = vld [vmem:[%s205_s29 + $0x8] sm:$0x1] (%p120_p3)  ;;  %v232_v5 = vld [vmem:[%s205_s29 + $0xa] sm:$0x1] (%p120_p3) }
  0x14   : > { %v234_v6 = vld [vmem:[%s205_s29 + $0xc] sm:$0x1] (%p120_p3)  ;;  %s204_s5 = scalar_lea.vmem (%p120_p3), [#allocation2], %s1516_s30  ;;  %v236_v7 = vld [vmem:[%s205_s29 + $0xe] sm:$0x1] (%p120_p3) }
  0x15   : > { %223 = vst [vmem:[%s204_s5] sm:$0x1] %v222_v0  ;;  %225 = vst [vmem:[%s204_s5 + $0x1] sm:$0x1] %v224_v1  ;;  %v238_v8 = vld [vmem:[%s205_s29 + $0x10] sm:$0x1] }
  0x16   : > { %227 = vst [vmem:[%s204_s5 + $0x2] sm:$0x1] %v226_v2  ;;  %229 = vst [vmem:[%s204_s5 + $0x3] sm:$0x1] %v228_v3 }
  0x17   : > { %231 = vst [vmem:[%s204_s5 + $0x4] sm:$0x1] %v230_v4  ;;  %233 = vst [vmem:[%s204_s5 + $0x5] sm:$0x1] %v232_v5 }
  0x18   : > { %235 = vst [vmem:[%s204_s5 + $0x6] sm:$0x1] %v234_v6  ;;  %237 = vst [vmem:[%s204_s5 + $0x7] sm:$0x1] %v236_v7 }
  0x19   : > { %239 = vst [vmem:[%s204_s5 + $0x8] sm:$0x1] %v238_v8 }
  0x1a PF: > { %p1388_p8 = scmp.ge.s32.totalorder %s1607_s19, 1  ;;  %p280_p9 = scmp.lt.s32.totalorder %s1607_s19, 3 }
  0x1c   : > { %p281_p10 = pnand %p1388_p8, %p280_p9 }
  0x1d   : > { %p325_p11 = scmp.lt.s32.totalorder (!%p281_p10), %s1599_s17, 1  ;;  %s1609_s21 = smov (!%p281_p10), 8  }
  0x1e   : > { %284 = sbr.rel (%p281_p10) target bundleno = 385 (0x181), region = 73  ;;  %s1610_s22 = smov (!%p281_p10), 7  }
  0x1f   : > { %s1611_s23 = smov (!%p281_p10), 9   ;;  %s1612_s26 = smov (!%p281_p10), 1  }
  0x20   : > { %s1613_s27 = smov (!%p281_p10), 127   ;;  %s1614_s28 = smov (!%p281_p10), 121  }
  0x21   : > { %s1616_s29 = smov (!%p281_p10), 120   ;;  %s1617_s30 = smov (!%p281_p10), 119  }
  0x22   : > { %s287_s9 = sand.u32 (!%p281_p10), 1, %s1591_s15  }
  0x23   : > { %vm360_vm0 = vcmask 64512   ;;  %v1394_v9 = vld [vmem:[%s1825_s1 + $0x10] sm:$0xff]  ;;  %v355_v10 = vld [vmem:[%s1825_s1] sm:$0xff]  ;;  %s326_s10 = scalar_select %p325_p11, %s1599_s17, 1  ;;  %v1615_v12 = vmov 0   ;;  %v1210_v13 = vld [vmem:[%s1826_s2 + $0x8] sm:$0xff] }
  0x24   : > { %1473 = vmatprep.mubr.msk.f32.mxu0 %vm360_vm0, %v1394_v9  ;;  %1478 = vmatprep.mubr.msk.f32.mxu1 %vm360_vm0, %v355_v10  ;;  %v1209_v14 = vld [vmem:[%s1826_s2] sm:$0xff]  ;;  %v1395_v23 = vld [vmem:[%s1825_s1 + $0x18] sm:$0xff]  ;;  %v356_v30 = vld [vmem:[%s1825_s1 + $0x8] sm:$0xff]  ;;  %s1441_s13 = sshll.u32 (%p1678_p6), %s1599_s17, 3 }
  0x25   : > { %s1390_s11 = sshll.u32 %s326_s10, 3  ;;  %1568 = vset.pattern.permute.xlu1 %v1615_v12  ;;  %1567 = vset.pattern.permute.xlu0 %v1615_v12  ;;  %s1517_s10 = smul.u32 9, %s287_s9  ;;  %v1402_v24 = vld [vmem:[%s1825_s1 + $0x20] sm:$0xff]  ;;  %v1403_v32 = vld [vmem:[%s1825_s1 + $0x28] sm:$0xff]  ;;  %v1408_v35 = vld [vmem:[%s1825_s1 + $0x30] sm:$0xff] }
  0x26   : > { %s328_s14 = scalar_lea.vmem %s1824_s0, %s1390_s11  ;;  %v1412_v38 = vld [vmem:[%s1825_s1 + $0x40] sm:$0xff]  ;;  %v1409_v40 = vld [vmem:[%s1825_s1 + $0x38] sm:$0xff]  ;;  %v1413_v42 = vld [vmem:[%s1825_s1 + $0x48] sm:$0xff] }
  0x27   : > { %v1706_v11 = vld [vmem:[%s328_s14] sm:$0xff]  ;;  %s1725_s11 = scalar_lea.vmem [#allocation2], %s1517_s10  ;;  %v1418_v45 = vld [vmem:[%s1825_s1 + $0x50] sm:$0xff]  ;;  %v1419_v49 = vld [vmem:[%s1825_s1 + $0x58] sm:$0xff]  ;;  %s1389_s10 = sshll.u32 %s287_s9, 4 }
  0x28   : > { %357 = vrot.lane.b32.xlu0 %v1706_v11, %s1609_s21  ;;  %535 = vrot.lane.b32.xlu1 %v1706_v11, %s1610_s22  ;;  %v1393_v15 = vld [vmem:[%s1725_s11 + $0x1] ss:$0 sm:$0xff]  ;;  %v1401_v16 = vld [vmem:[%s1725_s11 + $0x2] ss:$0 sm:$0xff]  ;;  %s324_s12 = scalar_lea.vmem [#allocation3], %s1389_s10 }
  0x29   : > { %v1391_v21 = vld [vmem:[%s1725_s11] ss:$0 sm:$0xff]  ;;  %v1407_v22 = vld [vmem:[%s1725_s11 + $0x3] ss:$0 sm:$0xff]  ;;  %v1417_v29 = vld [vmem:[%s1725_s11 + $0x5] ss:$0 sm:$0xff] }
  0x2a   : > { %v1423_v31 = vld [vmem:[%s1725_s11 + $0x6] ss:$0 sm:$0xff]  ;;  %v1429_v39 = vld [vmem:[%s1725_s11 + $0x7] ss:$0 sm:$0xff]  ;;  %v1435_v41 = vld [vmem:[%s1725_s11 + $0x8] ss:$0 sm:$0xff]  ;;  %s1236_s11 = scalar_lea.vmem (%p1678_p6), %s1828_s4, %s1441_s13 }
  0x2b   : > { %v1424_v48 = vld [vmem:[%s1825_s1 + $0x60] sm:$0xff]  ;;  %v1425_v50 = vld [vmem:[%s1825_s1 + $0x68] sm:$0xff]  ;;  %v1430_v51 = vld [vmem:[%s1825_s1 + $0x70] sm:$0xff] }
  0x2c   : > { %344 = vrot.lane.b32.xlu0 %v1706_v11, %s1611_s23  ;;  %633 = vrot.lane.b32.xlu1 %v1706_v11, %s1612_s26  ;;  %v1436_v52 = vld [vmem:[%s1825_s1 + $0x80] sm:$0xff]  ;;  %v1431_v53 = vld [vmem:[%s1825_s1 + $0x78] sm:$0xff] }
  0x2d   : > { %v1437_v54 = vld [vmem:[%s1825_s1 + $0x88] sm:$0xff] }
  0x30   : > { %817 = vrot.lane.b32.xlu0 %v1706_v11, %s1613_s27  ;;  %915 = vrot.lane.b32.xlu1 %v1706_v11, %s1614_s28 }
  0x34   : > { %1013 = vrot.lane.b32.xlu0 %v1706_v11, %s1616_s29  ;;  %1111 = vrot.lane.b32.xlu1 %v1706_v11, %s1617_s30 }
  0x38   : > { %1218 = vperm.xlu1 %1568, %v1210_v13   ;;  %1213 = vperm.xlu0 %1567, %v1209_v14  }
  0x9a   : > { %v358_v17 = vpop.permute.xlu0 %357  ;;  %v536_v18 = vpop.permute.xlu1 %535 }
  0x9b   : > { %v369_v19 = vmul.f32 %v1393_v15, %v358_v17  ;;  %v546_v20 = vmul.f32 %v1401_v16, %v536_v18 }
  0x9d   : > { %1471 = vmatprep.subr.mxu0 %v369_v19 }
  0x9e   : > { %v345_v25 = vpop.permute.xlu0 %344  ;;  %1472 = vmatpush3.msra.mxu0 %v369_v19  ;;  %v634_v26 = vpop.permute.xlu1 %633 }
  0x9f   : > { %v354_v27 = vmul.f32 %v1391_v21, %v345_v25  ;;  %1481 = vmatprep.subr.mxu0 %v546_v20  ;;  %v644_v28 = vmul.f32 %v1407_v22, %v634_v26  ;;  %1474 = vmatmul.mubr.msk.f32.vlgmr.msra.gmra.mxu0 %vm360_vm0, %v1395_v23 }
  0xa0   : > { %1482 = vmatpush3.msra.mxu0 %v546_v20  ;;  %1483 = vmatprep.mubr.msk.f32.mxu0 %vm360_vm0, %v1402_v24 }
  0xa1   : > { %1476 = vmatprep.subr.mxu1 %v354_v27  ;;  %1491 = vmatprep.subr.mxu0 %v1706_v11 }
  0xa2   : > { %1477 = vmatpush3.msra.mxu1 %v354_v27  ;;  %v818_v33 = vpop.permute.xlu0 %817  ;;  %v916_v34 = vpop.permute.xlu1 %915 }
  0xa3   : > { %v828_v36 = vmul.f32 %v1417_v29, %v818_v33  ;;  %1479 = vmatmul.mubr.msk.f32.vlgmr.msra.gmra.mxu1 %vm360_vm0, %v356_v30  ;;  %1486 = vmatprep.subr.mxu1 %v644_v28  ;;  %v926_v37 = vmul.f32 %v1423_v31, %v916_v34 }
  0xa4   : > { %1484 = vmatmul.mubr.msk.f32.vlgmr.msra.gmra.mxu0 %vm360_vm0, %v1403_v32  ;;  %1487 = vmatpush3.msra.mxu1 %v644_v28 }
  0xa5   : > { %1488 = vmatprep.mubr.msk.f32.mxu1 %vm360_vm0, %v1408_v35  ;;  %1492 = vmatpush3.msra.mxu0 %v1706_v11 }
  0xa6   : > { %1496 = vmatprep.subr.mxu1 %v828_v36  ;;  %v1014_v43 = vpop.permute.xlu0 %1013  ;;  %1493 = vmatprep.mubr.msk.f32.mxu0 %vm360_vm0, %v1412_v38  ;;  %v1112_v44 = vpop.permute.xlu1 %1111 }
  0xa7   : > { %v1024_v46 = vmul.f32 %v1429_v39, %v1014_v43  ;;  %1489 = vmatmul.mubr.msk.f32.vlgmr.msra.gmra.mxu1 %vm360_vm0, %v1409_v40  ;;  %1501 = vmatprep.subr.mxu0 %v926_v37  ;;  %v1122_v47 = vmul.f32 %v1435_v41, %v1112_v44 }
  0xa8   : > { %1497 = vmatpush3.msra.mxu1 %v828_v36  ;;  %1494 = vmatmul.mubr.msk.f32.vlgmr.msra.gmra.mxu0 %vm360_vm0, %v1413_v42 }
  0xa9   : > { %1502 = vmatpush3.msra.mxu0 %v926_v37  ;;  %1498 = vmatprep.mubr.msk.f32.mxu1 %vm360_vm0, %v1418_v45 }
  0xaa   : > { %1506 = vmatprep.subr.mxu1 %v1024_v46  ;;  %1503 = vmatprep.mubr.msk.f32.mxu0 %vm360_vm0, %v1424_v48 }
  0xab   : > { %1499 = vmatmul.mubr.msk.f32.vlgmr.msra.gmra.mxu1 %vm360_vm0, %v1419_v49  ;;  %1511 = vmatprep.subr.mxu0 %v1122_v47 }
  0xac   : > { %1507 = vmatpush3.msra.mxu1 %v1024_v46  ;;  %1504 = vmatmul.mubr.msk.f32.vlgmr.msra.gmra.mxu0 %vm360_vm0, %v1425_v50 }
  0xad   : > { %1512 = vmatpush3.msra.mxu0 %v1122_v47  ;;  %1508 = vmatprep.mubr.msk.f32.mxu1 %vm360_vm0, %v1430_v51 }
  0xae   : > { %1513 = vmatprep.mubr.msk.f32.mxu0 %vm360_vm0, %v1436_v52 }
  0xaf   : > { %1509 = vmatmul.mubr.msk.f32.vlgmr.msra.gmra.mxu1 %vm360_vm0, %v1431_v53 }
  0xb0   : > { %1514 = vmatmul.mubr.msk.f32.vlgmr.msra.gmra.mxu0 %vm360_vm0, %v1437_v54 }
  0xb3   : > { %v1219_v21 = vpop.permute.xlu1 %1218  ;;  %v1214_v25 = vpop.permute.xlu0 %1213 }
 0x15f   : > { %v1475_v55 = vpop.f32.mrf.mxu0 }
 0x161   : > { %v445_v56 = vpop.f32.mrf.mxu0 }
 0x163   : > { %v1480_v57 = vpop.f32.mrf.mxu1 }
 0x164   : > { %v532_v58 = vadd.f32 %v1480_v57, %v1475_v55  ;;  %v1485_v59 = vpop.f32.mrf.mxu0 }
 0x165   : > { %v526_v60 = vpop.f32.mrf.mxu1 }
 0x166   : > { %v632_v61 = vadd.f32 %v1485_v59, %v532_v58  ;;  %v527_v62 = vadd.f32 %v526_v60, %v445_v56  ;;  %v622_v63 = vpop.f32.mrf.mxu0 }
 0x167   : > { %v1490_v0 = vpop.f32.mrf.mxu1 }
 0x168   : > { %v631_v1 = vadd.f32 %v622_v63, %v527_v62  ;;  %v730_v2 = vadd.f32 %v1490_v0, %v632_v61  ;;  %v1495_v3 = vpop.f32.mrf.mxu0 }
 0x169   : > { %v720_v4 = vpop.f32.mrf.mxu1 }
 0x16a   : > { %v816_v5 = vadd.f32 %v1495_v3, %v730_v2  ;;  %v729_v6 = vadd.f32 %v720_v4, %v631_v1  ;;  %v806_v7 = vpop.f32.mrf.mxu0 }
 0x16b   : > { %v1500_v8 = vpop.f32.mrf.mxu1 }
 0x16c   : > { %v815_v9 = vadd.f32 %v806_v7, %v729_v6  ;;  %v914_v10 = vadd.f32 %v1500_v8, %v816_v5  ;;  %v1505_v11 = vpop.f32.mrf.mxu0 }
 0x16d   : > { %v904_v12 = vpop.f32.mrf.mxu1 }
 0x16e   : > { %v1012_v13 = vadd.f32 %v1505_v11, %v914_v10  ;;  %v913_v14 = vadd.f32 %v904_v12, %v815_v9  ;;  %v1002_v15 = vpop.f32.mrf.mxu0 }
 0x16f   : > { %v1510_v16 = vpop.f32.mrf.mxu1 }
 0x170   : > { %v1011_v17 = vadd.f32 %v1002_v15, %v913_v14  ;;  %v1110_v18 = vadd.f32 %v1510_v16, %v1012_v13  ;;  %v1515_v19 = vpop.f32.mrf.mxu0 }
 0x171   : > { %v1100_v20 = vpop.f32.mrf.mxu1 }
 0x172   : > { %v1208_v22 = vadd.f32 %v1515_v19, %v1110_v18  ;;  %v1109_v23 = vadd.f32 %v1100_v20, %v1011_v17  ;;  %v1198_v24 = vpop.f32.mrf.mxu0 }
 0x174   : > { %v1207_v26 = vadd.f32 %v1198_v24, %v1109_v23  ;;  %v1222_v27 = vadd.f32 %v1219_v21, %v1208_v22  ;;  %1231 = sbr.rel (!%p1678_p6) target bundleno = 385 (0x181), region = 81 }
 0x176   : > { %1224 = vst [vmem:[%s324_s12 + $0x8] sm:$0xff] %v1222_v27  ;;  %v1221_v28 = vadd.f32 %v1214_v25, %v1207_v26 }
 0x178   : > { %1223 = vst [vmem:[%s324_s12] sm:$0xff] %v1221_v28 }
 0x17d   : > { %v1269_v30 = vld [vmem:[%s324_s12 + $0x8] sm:$0xff] }
 0x17e   : > { %1270 = vst [vmem:[%s1236_s11 + $0x10] sm:$0xff] %v1269_v30 }
 0x17f   : > { %v1267_v29 = vld [vmem:[%s324_s12] sm:$0xff] }
 0x180   : > { %1268 = vst [vmem:[%s1236_s11] sm:$0xff] %v1267_v29 }
 0x181 PF: > { %s14_s19 = sadd.s32 1, %s1607_s19   ;;  %s1830_s15 = smov %s1595_s16 }
 0x182   : > { %p11_p12 = scmp.ge.s32.totalorder %s14_s19, 4   ;;  %s1831_s16 = smov %s1683_s25 }
 0x183   : > { %s1832_s17 = smov %s1603_s18  ;;  %s1833_s18 = smov %s1835_s20 }
 0x184   :  { %13 = sbr.rel (!%p11_p12) target bundleno = 3 (0x3), region = 174 }

// kernel: a_call__.7
= control target key start
LH: loop header
LB: loop body
LE: loop exit
PB: predicated region body
PF: predicated region fallthrough
CT: control target
= control target key end

     0   :  { %s411_s20 = smov 0   ;;  %s437_s0 = inlined_call_operand.<no memory space> [shape: f32[1], index: 0, kind: input, shape index: {}]   ;;  %s438_s1 = inlined_call_operand.vmem [shape: f32[4,256], index: 1, kind: input, shape index: {}]   ;;  %s439_s2 = inlined_call_operand.vmem [shape: f32[4,256], index: 2, kind: input, shape index: {}]   ;;  %s440_s3 = inlined_call_operand.vmem [shape: f32[4,256], index: 3, kind: input, shape index: {}]   ;;  %s441_s4 = inlined_call_operand.vmem [shape: f32[4,64], index: 4, kind: input, shape index: {}]   ;;  %s442_s5 = inlined_call_operand.vmem [shape: f32[4,256], index: 5, kind: output, shape index: {}]  }
   0x1   :  { %10 = sst [smem:[#allocation2]] %s437_s0 }
   0x2 LB: > { %s349_s21 = sadd.s32 4294967295, %s375_s20   ;;  %p353_p0 = scmp.ge.s32.totalorder %s375_s20, 1  ;;  %s375_s20 = sphi %s411_s20, %s16_s20  }
   0x3   : > { %p205_p1 = scmp.lt.s32.totalorder %s375_s20, 3 }
   0x5   : > { %p206_p2 = pnand %p353_p0, %p205_p1 }
   0x6   : > { %s377_s0 = smov (!%p206_p2), 64   ;;  %p239_p3 = scmp.lt.s32.totalorder (!%p206_p2), %s349_s21, 1 }
   0x7   : > { %209 = sbr.rel (%p206_p2) target bundleno = 138 (0x8a), region = 40  ;;  %s255_s25 = sld [smem:[#allocation2]] (!%p206_p2) }
   0xc   : > { %v257_v0 = vld [vmem:[%s441_s4] sm:$0xf]  ;;  %s444_s21 = smov (!%p239_p3, %s349_s21), 1  ;;  %vm262_vm0 = vcmask 523264  }
   0xd   : > { %259 = vrot.lane.b32.xlu0 %v257_v0, %s377_s0  ;;  %s354_s24 = sshll.u32 %s444_s21, 2  ;;  %v267_v6 = vstv %s255_s25 }
   0xe   : > { %s242_s28 = scalar_lea.vmem %s438_s1, %s354_s24  ;;  %s246_s6 = scalar_lea.vmem %s439_s2, %s354_s24 }
   0xf   : > { %v256_v1 = vld [vmem:[%s242_s28] sm:$0xf]  ;;  %s250_s9 = scalar_lea.vmem %s440_s3, %s354_s24  ;;  %s254_s12 = scalar_lea.vmem %s442_s5, %s354_s24 }
  0x10   : > { %v264_v4 = vld [vmem:[%s246_s6] sm:$0xf] }
  0x11   : > { %v269_v8 = vld [vmem:[%s250_s9] sm:$0xf] }
  0x7f   : > { %v260_v2 = vpop.permute.xlu0 %259 }
  0x80   : > { %v263_v3 = vsel %vm262_vm0, %v257_v0, %v260_v2 }
  0x81   : > { %v265_v5 = vsub.f32 %v256_v1, %v263_v3 }
  0x83   : > { %v266_v7 = vmul.f32 %v265_v5, %v264_v4 }
  0x85   : > { %v268_v9 = vmul.f32 %v267_v6, %v266_v7 }
  0x87   : > { %v270_v10 = vadd.f32 %v269_v8, %v268_v9 }
  0x89   : > { %271 = vst [vmem:[%s254_s12] sm:$0xf] %v270_v10 }
  0x8a PF: > { %s16_s20 = sadd.s32 1, %s375_s20  }
  0x8b   : > { %p13_p4 = scmp.ge.s32.totalorder %s16_s20, 4  }
  0x8d   :  { %15 = sbr.rel (!%p13_p4) target bundleno = 2 (0x2), region = 76 }

// kernel: a_call__.6
= control target key start
LH: loop header
LB: loop body
LE: loop exit
PB: predicated region body
PF: predicated region fallthrough
CT: control target
= control target key end

     0   :  { %s2122_s0 = inlined_call_operand.<no memory space> [shape: f32[1], index: 0, kind: input, shape index: {}]   ;;  %s2123_s1 = inlined_call_operand.vmem [shape: f32[4,256], index: 1, kind: input, shape index: {}]   ;;  %s2124_s2 = inlined_call_operand.vmem [shape: f32[4,256], index: 2, kind: input, shape index: {}]   ;;  %s2125_s3 = inlined_call_operand.vmem [shape: f32[4,256], index: 3, kind: input, shape index: {}]   ;;  %s2126_s4 = inlined_call_operand.vmem [shape: f32[4,64], index: 4, kind: input, shape index: {}]   ;;  %s2127_s5 = inlined_call_operand.vmem [shape: f32[9,4,4], index: 5, kind: input, shape index: {}]   ;;  %s2128_s6 = inlined_call_operand.vmem [shape: f32[4,1], index: 6, kind: input, shape index: {}]   ;;  %s2129_s7 = inlined_call_operand.vmem [shape: f32[9,1,256], index: 7, kind: input, shape index: {}]   ;;  %s2130_s8 = inlined_call_operand.vmem [shape: f32[4,256], index: 8, kind: output, shape index: {0}]   ;;  %s2131_s9 = inlined_call_operand.vmem [shape: f32[1,1,256], index: 9, kind: output, shape index: {1}]   ;;  %s2132_s10 = inlined_call_operand.vmem [shape: f32[1,1,256], index: 10, kind: output, shape index: {2}]  }
   0x1   :  { %16 = sst [smem:[#allocation2]] %s2122_s0 }
   0x2   :  { %s1940_s15 = smov 0   ;;  %s1942_s16 = smov 0  }
   0x3   :  { %s1944_s17 = smov 0   ;;  %s1946_s18 = smov 0  }
   0x4   :  { %s1948_s19 = smov 0  }
   0x5 LB: > { %s31_s0 = sadd.s32 1, %s1864_s18  ;;  %p220_p1 = scmp.ne.s32.totalorder %s1856_s16, %s1852_s15  ;;  %s1868_s19 = sphi %s1948_s19, %s22_s19   ;;  %s1864_s18 = sphi %s1946_s18, %s2136_s18   ;;  %s1860_s17 = sphi %s1944_s17, %s2135_s17   ;;  %s1856_s16 = sphi %s1942_s16, %s2134_s16   ;;  %s1852_s15 = sphi %s1940_s15, %s2133_s15  }
   0x6   : > { %p32_p0 = scmp.ge.s32.totalorder %s31_s0, 2  ;;  %p221_p2 = scmp.eq.s32.totalorder %s1868_s19, 0 }
   0x7   : > { %s213_s21 = sadd.s32 1, %s1856_s16  ;;  %p1662_p5 = scmp.ge.s32.totalorder %s1868_s19, 2 }
   0x8   : > { %s2138_s0 = smov (%p32_p0, %s31_s0), 0  ;;  %p222_p3 = por %p221_p2, %p220_p1 }
   0x9   : > { %s210_s20 = ssub.s32 %s1864_s18, %s2138_s0  ;;  %350 = sbr.rel (%p1662_p5) target bundleno = 24 (0x18), region = 32 }
   0xa   : > { %p211_p4 = scmp.eq.s32.totalorder %s210_s20, 0 }
   0xc   : > { %s1975_s22 = scalar_select %p211_p4, %s1856_s16, %s213_s21  }
   0xe   : > { %374 = sbr.rel (!%p222_p3) target bundleno = 24 (0x18), region = 48  ;;  %s376_s23 = sand.u32 (%p222_p3), 1, %s1856_s16  }
   0xf   : > { %s379_s26 = scalar_lea.vmem (%p222_p3), %s2129_s7, %s1864_s18  ;;  %s1774_s27 = smul.u32 (%p222_p3), 9, %s376_s23 }
  0x10   : > { %v396_v0 = vld [vmem:[%s379_s26] sm:$0x1] (%p222_p3)  ;;  %v398_v1 = vld [vmem:[%s379_s26 + $0x2] sm:$0x1] (%p222_p3)  ;;  %v400_v2 = vld [vmem:[%s379_s26 + $0x4] sm:$0x1] (%p222_p3) }
  0x11   : > { %v402_v3 = vld [vmem:[%s379_s26 + $0x6] sm:$0x1] (%p222_p3)  ;;  %v404_v4 = vld [vmem:[%s379_s26 + $0x8] sm:$0x1] (%p222_p3)  ;;  %v406_v5 = vld [vmem:[%s379_s26 + $0xa] sm:$0x1] (%p222_p3) }
  0x12   : > { %v408_v6 = vld [vmem:[%s379_s26 + $0xc] sm:$0x1] (%p222_p3)  ;;  %s378_s28 = scalar_lea.vmem (%p222_p3), [#allocation3], %s1774_s27  ;;  %v410_v7 = vld [vmem:[%s379_s26 + $0xe] sm:$0x1] (%p222_p3) }
  0x13   : > { %397 = vst [vmem:[%s378_s28] sm:$0x1] %v396_v0  ;;  %399 = vst [vmem:[%s378_s28 + $0x1] sm:$0x1] %v398_v1  ;;  %v412_v8 = vld [vmem:[%s379_s26 + $0x10] sm:$0x1] }
  0x14   : > { %401 = vst [vmem:[%s378_s28 + $0x2] sm:$0x1] %v400_v2  ;;  %403 = vst [vmem:[%s378_s28 + $0x3] sm:$0x1] %v402_v3 }
  0x15   : > { %405 = vst [vmem:[%s378_s28 + $0x4] sm:$0x1] %v404_v4  ;;  %407 = vst [vmem:[%s378_s28 + $0x5] sm:$0x1] %v406_v5 }
  0x16   : > { %409 = vst [vmem:[%s378_s28 + $0x6] sm:$0x1] %v408_v6  ;;  %411 = vst [vmem:[%s378_s28 + $0x7] sm:$0x1] %v410_v7 }
  0x17   : > { %413 = vst [vmem:[%s378_s28 + $0x8] sm:$0x1] %v412_v8 }
  0x18 PF: > { %p1663_p6 = scmp.ge.s32.totalorder %s1868_s19, 1  ;;  %p454_p7 = scmp.lt.s32.totalorder %s1868_s19, 3 }
  0x1a   : > { %p455_p8 = pnand %p1663_p6, %p454_p7 }
  0x1b   : > { %s1870_s11 = smov (!%p455_p8), 64   ;;  %p535_p9 = scmp.lt.s32.totalorder (!%p455_p8), %s1860_s17, 1 }
  0x1c   : > { %458 = sbr.rel (%p455_p8) target bundleno = 508 (0x1fc), region = 89  ;;  %s577_s13 = sld [smem:[#allocation2]] (!%p455_p8) }
  0x1d   : > { %s1873_s29 = smov (!%p455_p8), 9   ;;  %s1874_s30 = smov (!%p455_p8), 8  }
  0x1e   : > { %s1876_s14 = smov (!%p455_p8), 1   ;;  %s1878_s20 = smov (!%p455_p8), 127  }
  0x1f   : > { %s1881_s23 = smov (!%p455_p8), 119   ;;  %s461_s26 = sand.u32 (!%p455_p8), 1, %s1852_s15  }
  0x20   : > { %s1775_s27 = smul.u32 (!%p455_p8), 9, %s461_s26 }
  0x21   : > { %v579_v9 = vld [vmem:[%s2126_s4] sm:$0xf]  ;;  %s2140_s17 = smov (!%p535_p9, %s1860_s17), 1  ;;  %vm584_vm0 = vcmask 523264   ;;  %v1871_v10 = vmov 0.0   ;;  %vm1872_vm1 = vmmov 0  }
  0x22   : > { %581 = vrot.lane.b32.xlu0 %v579_v9, %s1870_s11  ;;  %s1993_s12 = sshll.u32 %s2140_s17, 2  ;;  %1729 = vmatprep.subr.mxu0 %v1871_v10  ;;  %v589_v16 = vstv %s577_s13  ;;  %s1875_s11 = smov 7   ;;  %v1877_v21 = vmov 0   ;;  %v1398_v22 = vld [vmem:[%s2128_s6] sm:$0xf]  ;;  %vm624_vm2 = vcmask 1043456  }
  0x23   : > { %s538_s21 = scalar_lea.vmem %s2123_s1, %s1993_s12  ;;  %s542_s25 = scalar_lea.vmem %s2124_s2, %s1993_s12  ;;  %1734 = vmatprep.subr.mxu1 %v1871_v10  ;;  %1731 = vmatprep.mubr.msk.f32.mxu0 %vm1872_vm1, %v1871_v10  ;;  %v1671_v29 = vld [vmem:[%s2127_s5 + $0x4] sm:$0xf]  ;;  %vm620_vm3 = vcmask 31744   ;;  %v605_v30 = vld [vmem:[%s2127_s5] sm:$0xf] }
  0x24   : > { %v578_v11 = vld [vmem:[%s538_s21] sm:$0xf]  ;;  %1736 = vmatprep.mubr.msk.f32.mxu1 %vm1872_vm1, %v1871_v10  ;;  %s546_s28 = scalar_lea.vmem %s2125_s3, %s1993_s12  ;;  %1828 = vset.pattern.permute.xlu1 %v1877_v21  ;;  %s1879_s21 = smov 121   ;;  %v1678_v37 = vld [vmem:[%s2127_s5 + $0x8] sm:$0xf] }
  0x25   : > { %v586_v14 = vld [vmem:[%s542_s25] sm:$0xf]  ;;  %1829 = vset.pattern.permute.xlu0 %v1877_v21  ;;  %s1880_s13 = smov 120   ;;  %v1683_v40 = vld [vmem:[%s2127_s5 + $0xc] sm:$0xf]  ;;  %s576_s26 = scalar_lea.vmem %s2132_s10, %s2140_s17 }
  0x26   : > { %v591_v18 = vld [vmem:[%s546_s28] sm:$0xf]  ;;  %s2017_s28 = scalar_lea.vmem [#allocation3], %s1775_s27  ;;  %v1686_v45 = vld [vmem:[%s2127_s5 + $0x10] sm:$0xf] }
  0x27   : > { %v1668_v23 = vld [vmem:[%s2017_s28] ss:$0 sm:$0xff]  ;;  %v1670_v24 = vld [vmem:[%s2017_s28 + $0x1] ss:$0 sm:$0xff]  ;;  %v1677_v31 = vld [vmem:[%s2017_s28 + $0x2] ss:$0 sm:$0xff] }
  0x28   : > { %v1682_v32 = vld [vmem:[%s2017_s28 + $0x3] ss:$0 sm:$0xff]  ;;  %v1690_v38 = vld [vmem:[%s2017_s28 + $0x5] ss:$0 sm:$0xff]  ;;  %v1695_v39 = vld [vmem:[%s2017_s28 + $0x6] ss:$0 sm:$0xff] }
  0x29   : > { %v1700_v46 = vld [vmem:[%s2017_s28 + $0x7] ss:$0 sm:$0xff]  ;;  %v1705_v47 = vld [vmem:[%s2017_s28 + $0x8] ss:$0 sm:$0xff]  ;;  %v1691_v48 = vld [vmem:[%s2127_s5 + $0x14] sm:$0xf] }
  0x2a   : > { %v1696_v53 = vld [vmem:[%s2127_s5 + $0x18] sm:$0xf]  ;;  %v1701_v54 = vld [vmem:[%s2127_s5 + $0x1c] sm:$0xf]  ;;  %v1706_v55 = vld [vmem:[%s2127_s5 + $0x20] sm:$0xf] }
  0x94   : > { %v582_v12 = vpop.permute.xlu0 %581 }
  0x95   : > { %v585_v13 = vsel %vm584_vm0, %v579_v9, %v582_v12 }
  0x96   : > { %v587_v15 = vsub.f32 %v578_v11, %v585_v13 }
  0x98   : > { %v588_v17 = vmul.f32 %v587_v15, %v586_v14 }
  0x9a   : > { %v590_v19 = vmul.f32 %v589_v16, %v588_v17 }
  0x9c   : > { %v592_v20 = vadd.f32 %v591_v18, %v590_v19 }
  0x9e   : > { %594 = vrot.lane.b32.xlu1 %v592_v20, %s1873_s29  ;;  %606 = vrot.lane.b32.xlu0 %v592_v20, %s1874_s30 }
  0xa2   : > { %774 = vrot.lane.b32.xlu1 %v592_v20, %s1875_s11  ;;  %865 = vrot.lane.b32.xlu0 %v592_v20, %s1876_s14 }
  0xa6   : > { %1034 = vrot.lane.b32.xlu1 %v592_v20, %s1878_s20  ;;  %1125 = vrot.lane.b32.xlu0 %v592_v20, %s1879_s21  ;;  %s562_s21 = scalar_lea.vmem %s2130_s8, %s1993_s12 }
  0xaa   : > { %1216 = vrot.lane.b32.xlu1 %v592_v20, %s1880_s13  ;;  %1307 = vrot.lane.b32.xlu0 %v592_v20, %s1881_s23  ;;  %s569_s23 = scalar_lea.vmem %s2131_s9, %s2140_s17 }
  0xae   : > { %1401 = vperm.xlu1 %1828, %v1398_v22  }
 0x110   : > { %v595_v25 = vpop.permute.xlu1 %594  ;;  %v607_v26 = vpop.permute.xlu0 %606 }
 0x111   : > { %v604_v27 = vmul.f32 %v1668_v23, %v595_v25  ;;  %v617_v28 = vmul.f32 %v1670_v24, %v607_v26 }
 0x113   : > { %1730 = vmatpush3.msk.msra.mxu0 %vm624_vm2, %v617_v28  ;;  %1735 = vmatpush3.msk.msra.mxu1 %vm624_vm2, %v604_v27 }
 0x114   : > { %v775_v33 = vpop.permute.xlu1 %774  ;;  %v866_v34 = vpop.permute.xlu0 %865  ;;  %1732 = vmatmul.mubr.msk.f32.vlgmr.msra.gmra.mxu0 %vm620_vm3, %v1671_v29  ;;  %1737 = vmatmul.mubr.msk.f32.vlgmr.msra.gmra.mxu1 %vm620_vm3, %v605_v30 }
 0x115   : > { %v785_v35 = vmul.f32 %v1677_v31, %v775_v33  ;;  %v876_v36 = vmul.f32 %v1682_v32, %v866_v34  ;;  %1739 = vmatprep.subr.mxu0 %v1871_v10  ;;  %1744 = vmatprep.subr.mxu1 %v1871_v10 }
 0x116   : > { %1741 = vmatprep.mubr.msk.f32.mxu0 %vm1872_vm1, %v1871_v10  ;;  %1746 = vmatprep.mubr.msk.f32.mxu1 %vm1872_vm1, %v1871_v10 }
 0x117   : > { %1740 = vmatpush3.msk.msra.mxu0 %vm624_vm2, %v785_v35  ;;  %1745 = vmatpush3.msk.msra.mxu1 %vm624_vm2, %v876_v36 }
 0x118   : > { %v1035_v41 = vpop.permute.xlu1 %1034  ;;  %v1126_v42 = vpop.permute.xlu0 %1125  ;;  %1742 = vmatmul.mubr.msk.f32.vlgmr.msra.gmra.mxu0 %vm620_vm3, %v1678_v37  ;;  %1749 = vmatprep.subr.mxu0 %v1871_v10 }
 0x119   : > { %v1045_v43 = vmul.f32 %v1690_v38, %v1035_v41  ;;  %v1136_v44 = vmul.f32 %v1695_v39, %v1126_v42  ;;  %1750 = vmatpush3.msk.msra.mxu0 %vm624_vm2, %v592_v20  ;;  %1747 = vmatmul.mubr.msk.f32.vlgmr.msra.gmra.mxu1 %vm620_vm3, %v1683_v40 }
 0x11a   : > { %1754 = vmatprep.subr.mxu1 %v1871_v10  ;;  %1751 = vmatprep.mubr.msk.f32.mxu0 %vm1872_vm1, %v1871_v10 }
 0x11b   : > { %1755 = vmatpush3.msk.msra.mxu1 %vm624_vm2, %v1045_v43  ;;  %1759 = vmatprep.subr.mxu0 %v1871_v10 }
 0x11c   : > { %v1217_v49 = vpop.permute.xlu1 %1216  ;;  %v1308_v50 = vpop.permute.xlu0 %1307  ;;  %1752 = vmatmul.mubr.msk.f32.vlgmr.msra.gmra.mxu0 %vm620_vm3, %v1686_v45  ;;  %1756 = vmatprep.mubr.msk.f32.mxu1 %vm1872_vm1, %v1871_v10 }
 0x11d   : > { %v1227_v51 = vmul.f32 %v1700_v46, %v1217_v49  ;;  %v1318_v52 = vmul.f32 %v1705_v47, %v1308_v50  ;;  %1760 = vmatpush3.msk.msra.mxu0 %vm624_vm2, %v1136_v44  ;;  %1757 = vmatmul.mubr.msk.f32.vlgmr.msra.gmra.mxu1 %vm620_vm3, %v1691_v48 }
 0x11e   : > { %1764 = vmatprep.subr.mxu1 %v1871_v10  ;;  %1761 = vmatprep.mubr.msk.f32.mxu0 %vm1872_vm1, %v1871_v10 }
 0x11f   : > { %1765 = vmatpush3.msk.msra.mxu1 %vm624_vm2, %v1227_v51  ;;  %1769 = vmatprep.subr.mxu0 %v1871_v10 }
 0x120   : > { %1762 = vmatmul.mubr.msk.f32.vlgmr.msra.gmra.mxu0 %vm620_vm3, %v1696_v53  ;;  %1766 = vmatprep.mubr.msk.f32.mxu1 %vm1872_vm1, %v1871_v10 }
 0x121   : > { %1770 = vmatpush3.msk.msra.mxu0 %vm624_vm2, %v1318_v52  ;;  %1767 = vmatmul.mubr.msk.f32.vlgmr.msra.gmra.mxu1 %vm620_vm3, %v1701_v54 }
 0x122   : > { %1771 = vmatprep.mubr.msk.f32.mxu0 %vm1872_vm1, %v1871_v10 }
 0x124   : > { %1772 = vmatmul.mubr.msk.f32.vlgmr.msra.gmra.mxu0 %vm620_vm3, %v1706_v55 }
 0x129   : > { %v1402_v16 = vpop.permute.xlu1 %1401 }
 0x1d4   : > { %v694_v56 = vpop.f32.mrf.mxu0  ;;  %v770_v57 = vpop.f32.mrf.mxu1 }
 0x1d5   : > { %v771_v60 = vadd.f32 %v770_v57, %v694_v56 }
 0x1d6   : > { %v1733_v58 = vpop.f32.mrf.mxu0  ;;  %v1738_v59 = vpop.f32.mrf.mxu1 }
 0x1d8   : > { %v860_v61 = vpop.f32.mrf.mxu0 }
 0x1d9   : > { %v864_v62 = vadd.f32 %v860_v61, %v771_v60  ;;  %v951_v63 = vpop.f32.mrf.mxu1 }
 0x1da   : > { %v1743_v0 = vpop.f32.mrf.mxu0 }
 0x1db   : > { %v955_v1 = vadd.f32 %v951_v63, %v864_v62  ;;  %v1748_v2 = vpop.f32.mrf.mxu1 }
 0x1dc   : > { %v1029_v3 = vpop.f32.mrf.mxu0 }
 0x1dd   : > { %v1033_v4 = vadd.f32 %v1029_v3, %v955_v1  ;;  %v1120_v5 = vpop.f32.mrf.mxu1 }
 0x1de   : > { %v1753_v6 = vpop.f32.mrf.mxu0 }
 0x1df   : > { %v1124_v7 = vadd.f32 %v1120_v5, %v1033_v4  ;;  %v1758_v8 = vpop.f32.mrf.mxu1 }
 0x1e0   : > { %v1211_v9 = vpop.f32.mrf.mxu0 }
 0x1e1   : > { %v1215_v10 = vadd.f32 %v1211_v9, %v1124_v7  ;;  %v1302_v11 = vpop.f32.mrf.mxu1 }
 0x1e2   : > { %v1763_v12 = vpop.f32.mrf.mxu0 }
 0x1e3   : > { %v1306_v13 = vadd.f32 %v1302_v11, %v1215_v10  ;;  %v1768_v14 = vpop.f32.mrf.mxu1 }
 0x1e4   : > { %v1393_v15 = vpop.f32.mrf.mxu0 }
 0x1e5   : > { %v1397_v17 = vadd.f32 %v1393_v15, %v1306_v13 }
 0x1e6   : > { %v1773_v18 = vpop.f32.mrf.mxu0 }
 0x1e7   : > { %v1404_v19 = vadd.f32 %v1402_v16, %v1397_v17 }
 0x1e9   : > { %vm1405_vm4 = vcmp.ge.f32.partialorder %v1404_v19, 0.0  ;;  %v1406_v20 = vmul.f32 0.01, %v1404_v19 }
 0x1eb   : > { %v1407_v21 = vsel %vm1405_vm4, %v1404_v19, %v1406_v20 }
 0x1ec   : > { %1408 = vst [vmem:[%s562_s21] sm:$0xf] %v1407_v21  ;;  %v1409_v22 = vsel %vm624_vm2, %v1407_v21, 0.0  ;;  %v1417_v23 = vmul.f32 %v1407_v21, %v1407_v21 }
 0x1ed   : > { %v1410_v24 = vrot.slane %v1409_v22, 4 }
 0x1ee   : > { %v1418_v25 = vsel %vm624_vm2, %v1417_v23, 0.0 }
 0x1ef   : > { %v1411_v26 = vadd.f32 %v1410_v24, %v1409_v22  ;;  %v1419_v27 = vrot.slane %v1418_v25, 4 }
 0x1f1   : > { %v1412_v28 = vrot.slane %v1411_v26, 2  ;;  %v1420_v29 = vadd.f32 %v1419_v27, %v1418_v25 }
 0x1f3   : > { %v1413_v30 = vadd.f32 %v1412_v28, %v1411_v26  ;;  %v1421_v31 = vrot.slane %v1420_v29, 2 }
 0x1f5   : > { %v1414_v32 = vrot.slane %v1413_v30, 1  ;;  %v1422_v33 = vadd.f32 %v1421_v31, %v1420_v29 }
 0x1f7   : > { %v1415_v34 = vadd.f32 %v1414_v32, %v1413_v30  ;;  %v1423_v35 = vrot.slane %v1422_v33, 1 }
 0x1f9   : > { %1416 = vst [vmem:[%s569_s23] sm:$0x1] %v1415_v34  ;;  %v1424_v36 = vadd.f32 %v1423_v35, %v1422_v33 }
 0x1fb   : > { %1425 = vst [vmem:[%s576_s26] sm:$0x1] %v1424_v36 }
 0x1fc PF: > { %s22_s19 = sadd.s32 1, %s1868_s19   ;;  %s2133_s15 = smov %s1856_s16 }
 0x1fd   : > { %p19_p10 = scmp.ge.s32.totalorder %s22_s19, 4   ;;  %s2134_s16 = smov %s1975_s22 }
 0x1fe   : > { %s2135_s17 = smov %s1864_s18  ;;  %s2136_s18 = smov %s2138_s0 }
 0x1ff   :  { %21 = sbr.rel (!%p19_p10) target bundleno = 5 (0x5), region = 182 }

</bundles_post_ra>
